<compile_context>
chip_gen: v7x
topology: tpu7x:2x2x1
jax: 0.10.0
libtpu: 0.0.40
codegen_flags: <defaults>
</compile_context>

<pallas_src>
import math

import jax
import jax.numpy as jnp
from jax import lax
from jax.experimental import pallas as pl
from jax.experimental.pallas import tpu as pltpu

EXPANSION = 4
BN_EPS = 1e-5


def bottleneck_kernel(x_ref, w1_ref, w2_ref, w3_ref,
                      s1_ref, b1_ref, s2_ref, b2_ref, s3_ref, b3_ref,
                      out_ref, pad_ref):
    # Per grid step (one image):
    #   x_ref     : (1, H, W, Cin)     bf16
    #   w1_ref    : (Cin, Cm)          bf16   1x1 conv as matmul
    #   w2_ref    : (3, 3*Cm, Cm)      bf16   3x3 conv, kx folded into K
    #   w3_ref    : (Cm, Cout)         bf16   1x1 conv as matmul
    #   s*/b*     : (1, C)             f32    folded BN scale / bias
    #   out_ref   : (1, H, W, Cout)    bf16
    #   pad_ref   : (H+2, W+2, Cm)     f32    zero-padded conv2 input (scratch)
    H = x_ref.shape[1]
    W = x_ref.shape[2]
    Cin = x_ref.shape[3]
    Cm = w1_ref.shape[2] if False else w1_ref.shape[1]
    Cout = w3_ref.shape[1]

    xf = x_ref[0].reshape(H * W, Cin)                 # (H*W, Cin) bf16

    # ---- conv1 (1x1) + bn1 + relu1 : bf16 MXU operands, f32 accumulate ----
    y1 = jnp.dot(xf, w1_ref[...], preferred_element_type=jnp.float32)
    y1 = jnp.maximum(y1 * s1_ref[...] + b1_ref[...], 0.0)        # (H*W, Cm) f32

    # ---- conv2 (3x3, pad=1, stride=1) + bn2 + relu2 ----
    # Maintain the zero halo by re-zeroing only the four thin border strips
    # (the interior is fully overwritten every grid step), which is also safe
    # when the batch grid axis is sharded across TensorCores.
    pad_ref[pl.ds(0, 1), :, :] = jnp.zeros((1, W + 2, Cm), jnp.float32)
    pad_ref[pl.ds(H + 1, 1), :, :] = jnp.zeros((1, W + 2, Cm), jnp.float32)
    pad_ref[:, pl.ds(0, 1), :] = jnp.zeros((H + 2, 1, Cm), jnp.float32)
    pad_ref[:, pl.ds(W + 1, 1), :] = jnp.zeros((H + 2, 1, Cm), jnp.float32)
    pad_ref[pl.ds(1, H), pl.ds(1, W), :] = y1.reshape(H, W, Cm)

    # kx taps folded into the contraction dimension: per ky, lane-concatenate
    # the three kx-shifted planes into one lane-dense (H*W, 3*Cm) patch and do
    # a single K=3*Cm MXU dot.  Accumulator is seeded by the first dot.
    acc = None
    for ky in range(3):                               # static unrolled taps
        patch = jnp.concatenate(
            [pad_ref[pl.ds(ky, H), pl.ds(kx, W), :] for kx in range(3)],
            axis=-1).reshape(H * W, 3 * Cm)
        d = jnp.dot(patch.astype(jnp.bfloat16), w2_ref[ky],
                    preferred_element_type=jnp.float32)
        acc = d if acc is None else acc + d
    y2 = jnp.maximum(acc * s2_ref[...] + b2_ref[...], 0.0)       # (H*W, Cm) f32

    # ---- conv3 (1x1) + bn3 ----
    y3 = jnp.dot(y2.astype(jnp.bfloat16), w3_ref[...],
                 preferred_element_type=jnp.float32)             # (H*W, Cout)
    y3 = y3 * s3_ref[...] + b3_ref[...]

    # ---- residual add (downsample=None -> identity) in f32 + relu3 ----
    out = jnp.maximum(y3 + xf.astype(jnp.float32), 0.0)
    out_ref[0] = out.astype(out_ref.dtype).reshape(H, W, Cout)


def fold_bn(gamma, beta, mean, var, eps=BN_EPS):
    scale = gamma / jnp.sqrt(var + eps)
    bias = beta - mean * scale
    return (scale.reshape(1, -1).astype(jnp.float32),
            bias.reshape(1, -1).astype(jnp.float32))


def _nbytes(shape, dtype):
    return math.prod(shape) * jnp.dtype(dtype).itemsize


def _physical_vmem_bytes():
    try:
        info = pltpu.get_tpu_info()
        for attr in ("vmem_capacity_bytes", "vmem_size_bytes", "vmem_bytes"):
            v = getattr(info, attr, None)
            if v:
                return int(v)
    except Exception:
        pass
    return 64 * 1024 * 1024     # smallest per-core VMEM across v5e/v6e/v7x


def bottleneck_forward(x_nchw, params):
    """x_nchw: (N, Cin, H, W) float32.  Returns (N, Cout, H, W) float32."""
    # bf16 activation streaming across the kernel boundary (op is HBM-bound).
    x = jnp.transpose(x_nchw, (0, 2, 3, 1)).astype(jnp.bfloat16)   # NHWC bf16
    N, H, W, Cin = x.shape

    w1 = params["w1"].astype(jnp.bfloat16)            # (Cin, Cm)
    w2 = params["w2"].astype(jnp.bfloat16)            # (3, 3, Cm, Cm) HWIO
    w3 = params["w3"].astype(jnp.bfloat16)            # (Cm, Cout)
    Cm = w1.shape[1]
    Cout = w3.shape[1]
    assert Cin == Cout, "identity shortcut requires inplanes == planes * expansion"
    # TODO(synk): stride>1 and the optional `downsample` 1x1-conv shortcut of
    # the module are not implemented (default stride=1 / downsample=None path).
    w2cat = w2.reshape(3, 3 * Cm, Cm)                 # fold kx into the K dim

    s1, b1 = fold_bn(*params["bn1"])
    s2, b2 = fold_bn(*params["bn2"])
    s3, b3 = fold_bn(*params["bn3"])

    vec_spec_m = pl.BlockSpec((1, Cm), lambda n: (0, 0))
    vec_spec_o = pl.BlockSpec((1, Cout), lambda n: (0, 0))

    # Honest VMEM estimate: double-buffered bf16 streams, one resident weight
    # copy (constant index_map blocks are not re-fetched), scratch, f32 temps.
    est = (2 * _nbytes((1, H, W, Cin), jnp.bfloat16)
           + 2 * _nbytes((1, H, W, Cout), jnp.bfloat16)
           + _nbytes((Cin, Cm), jnp.bfloat16)
           + _nbytes((3, 3 * Cm, Cm), jnp.bfloat16)
           + _nbytes((Cm, Cout), jnp.bfloat16)
           + 4 * _nbytes((1, Cm), jnp.float32)
           + 2 * _nbytes((1, Cout), jnp.float32)
           + _nbytes((H + 2, W + 2, Cm), jnp.float32)
           + 2 * _nbytes((H * W, 3 * Cm), jnp.float32)
           + 6 * _nbytes((H * W, max(Cm, Cout)), jnp.float32))
    cap = (_physical_vmem_bytes() * 7) // 8            # headroom for Mosaic scratch
    vmem_limit = int(min(max(est * 3 // 2, 16 * 1024 * 1024), cap))

    # TODO(synk): for production spatial sizes (e.g. 56x56x256) add a row-tiled
    # spatial grid axis (1-row halo sourced from the neighboring tile) marked
    # "parallel" so v7x's two TensorCores are fed within 64 MiB; on v5e/v6e use
    # the spare VMEM for multi-image blocks or pl.Buffered(3) on x/out specs.
    out = pl.pallas_call(
        bottleneck_kernel,
        out_shape=jax.ShapeDtypeStruct((N, H, W, Cout), jnp.bfloat16),
        grid_spec=pltpu.PrefetchScalarGridSpec(
            num_scalar_prefetch=0,
            grid=(N,),
            in_specs=[
                pl.BlockSpec((1, H, W, Cin), lambda n: (n, 0, 0, 0)),
                pl.BlockSpec((Cin, Cm), lambda n: (0, 0)),
                pl.BlockSpec((3, 3 * Cm, Cm), lambda n: (0, 0, 0)),
                pl.BlockSpec((Cm, Cout), lambda n: (0, 0)),
                vec_spec_m, vec_spec_m,   # bn1 scale / bias
                vec_spec_m, vec_spec_m,   # bn2 scale / bias
                vec_spec_o, vec_spec_o,   # bn3 scale / bias
            ],
            out_specs=pl.BlockSpec((1, H, W, Cout), lambda n: (n, 0, 0, 0)),
            scratch_shapes=[
                pltpu.VMEM((H + 2, W + 2, Cm), jnp.float32),
            ],
        ),
        compiler_params=pltpu.CompilerParams(
            dimension_semantics=("parallel",),
            vmem_limit_bytes=vmem_limit,
        ),
    )(x, w1, w2cat, w3, s1, b1, s2, b2, s3, b3)

    return jnp.transpose(out.astype(jnp.float32), (0, 3, 1, 2))   # back to NCHW


def reference_forward(x_nchw, params, matmul_dtype=jnp.float32):
    """Pure-JAX reference (XLA convs) of the same Bottleneck forward.

    matmul_dtype=bfloat16 mirrors the kernel's precision scheme (bf16 activation
    streaming and MXU operands, f32 accumulation/epilogue, f32 residual add of
    the bf16-quantized shortcut, bf16 output); float32 is the exact reference.
    """
    matched = jnp.dtype(matmul_dtype) != jnp.dtype(jnp.float32)
    x = jnp.transpose(x_nchw, (0, 2, 3, 1)).astype(jnp.float32)
    if matched:
        x = x.astype(matmul_dtype).astype(jnp.float32)    # kernel receives bf16 x
    w1, w2, w3 = params["w1"], params["w2"], params["w3"]
    Cin, Cm = w1.shape
    Cout = w3.shape[1]

    def conv(y, w_hwio, pad):
        return lax.conv_general_dilated(
            y.astype(matmul_dtype), w_hwio.astype(matmul_dtype), (1, 1),
            [(pad, pad), (pad, pad)],
            dimension_numbers=("NHWC", "HWIO", "NHWC"),
            preferred_element_type=jnp.float32,
            precision=lax.Precision.HIGHEST)

    def bn(y, gbmv):
        s, b = fold_bn(*gbmv)
        return y * s.reshape(1, 1, 1, -1) + b.reshape(1, 1, 1, -1)

    out = conv(x, w1.reshape(1, 1, Cin, Cm), 0)
    out = jax.nn.relu(bn(out, params["bn1"]))
    out = conv(out, w2, 1)
    out = jax.nn.relu(bn(out, params["bn2"]))
    out = conv(out, w3.reshape(1, 1, Cm, Cout), 0)
    out = bn(out, params["bn3"])
    out = jax.nn.relu(out + x)
    if matched:
        out = out.astype(matmul_dtype).astype(jnp.float32)  # kernel streams bf16 out
    return jnp.transpose(out, (0, 3, 1, 2))


def init_params(key, inplanes, planes):
    """Deterministic synthetic weights matching Bottleneck.__init__ shapes."""
    keys = jax.random.split(key, 12)
    cout = planes * EXPANSION
    # PyTorch conv weight layouts: (out, in, kh, kw); convert to kernel layouts.
    conv1_w = 0.1 * jax.random.normal(keys[0], (planes, inplanes, 1, 1), jnp.float32)
    conv2_w = 0.1 * jax.random.normal(keys[1], (planes, planes, 3, 3), jnp.float32)
    conv3_w = 0.1 * jax.random.normal(keys[2], (cout, planes, 1, 1), jnp.float32)

    def bn_params(k, c):
        k1, k2, k3, k4 = jax.random.split(k, 4)
        gamma = 1.0 + 0.1 * jax.random.normal(k1, (c,), jnp.float32)
        beta = 0.1 * jax.random.normal(k2, (c,), jnp.float32)
        mean = 0.1 * jax.random.normal(k3, (c,), jnp.float32)
        var = jax.random.uniform(k4, (c,), jnp.float32, 0.5, 1.5)
        return (gamma, beta, mean, var)

    return {
        "w1": jnp.transpose(conv1_w.reshape(planes, inplanes)),          # (Cin, Cm)
        "w2": jnp.transpose(conv2_w, (2, 3, 1, 0)),                      # (3,3,Cm,Cm) HWIO
        "w3": jnp.transpose(conv3_w.reshape(cout, planes)),              # (Cm, Cout)
        "bn1": bn_params(keys[3], planes),
        "bn2": bn_params(keys[4], planes),
        "bn3": bn_params(keys[5], cout),
    }


if __name__ == "__main__":
    # Small shapes consistent with the module: inplanes = planes * expansion so
    # the identity shortcut (downsample=None) applies.  planes=128 keeps every
    # matmul/concat dimension lane-aligned (Cm=128, 3*Cm=384, Cout=512) while
    # the spatial size stays tiny.
    N, planes, H, W = 2, 128, 8, 8
    inplanes = planes * EXPANSION        # 512

    key = jax.random.PRNGKey(0)
    kx, kp = jax.random.split(key)
    x = jax.random.normal(kx, (N, inplanes, H, W), jnp.float32)   # NCHW input
    params = init_params(kp, inplanes, planes)

    out = jax.block_until_ready(bottleneck_forward(x, params))
    assert out.shape == (N, inplanes, H, W)

    # Matched-precision reference (bf16 streams + MXU operands, f32 accumulate):
    # should agree up to summation-order rounding only.
    ref_bf16 = jax.block_until_ready(
        reference_forward(x, params, matmul_dtype=jnp.bfloat16))
    scale = float(jnp.max(jnp.abs(ref_bf16))) + 1e-6
    err_matched = float(jnp.max(jnp.abs(out - ref_bf16))) / scale
    assert err_matched < 5e-3, f"mismatch vs matched-precision reference: {err_matched}"

    # Full-f32 reference: only bf16 quantization noise should remain.
    ref_f32 = jax.block_until_ready(reference_forward(x, params))
    scale = float(jnp.max(jnp.abs(ref_f32))) + 1e-6
    err_f32 = float(jnp.max(jnp.abs(out - ref_f32))) / scale
    assert err_f32 < 5e-2, f"mismatch vs f32 reference: {err_f32}"

    print("KERNEL_OK")
</pallas_src>

<mosaic_0001>
module attributes {stable_mosaic.version = 11 : i64} {
  func.func @bottleneck_kernel(%arg0: i32, %arg1: memref<1x8x8x512xbf16, #tpu.memory_space<vmem>>, %arg2: memref<512x128xbf16, #tpu.memory_space<vmem>>, %arg3: memref<3x384x128xbf16, #tpu.memory_space<vmem>>, %arg4: memref<128x512xbf16, #tpu.memory_space<vmem>>, %arg5: memref<1x128xf32, #tpu.memory_space<vmem>>, %arg6: memref<1x128xf32, #tpu.memory_space<vmem>>, %arg7: memref<1x128xf32, #tpu.memory_space<vmem>>, %arg8: memref<1x128xf32, #tpu.memory_space<vmem>>, %arg9: memref<1x512xf32, #tpu.memory_space<vmem>>, %arg10: memref<1x512xf32, #tpu.memory_space<vmem>>, %arg11: memref<1x8x8x512xbf16, #tpu.memory_space<vmem>>, %arg12: memref<10x10x128xf32, #tpu.memory_space<vmem>>) attributes {dimension_semantics = [#tpu.dimension_semantics<parallel>], iteration_bounds = array<i64: 2>, scalar_prefetch = 0 : i64, scratch_operands = 1 : i64, tpu.core_type = #tpu.core_type<tc>, window_params = [{transform_indices = @transform_0, window_bounds = array<i64: 1, 8, 8, 512>}, {pipeline_mode = #tpu.pipeline_mode<synchronous>, transform_indices = @transform_1, window_bounds = array<i64: 512, 128>}, {pipeline_mode = #tpu.pipeline_mode<synchronous>, transform_indices = @transform_2, window_bounds = array<i64: 3, 384, 128>}, {pipeline_mode = #tpu.pipeline_mode<synchronous>, transform_indices = @transform_3, window_bounds = array<i64: 128, 512>}, {pipeline_mode = #tpu.pipeline_mode<synchronous>, transform_indices = @transform_4, window_bounds = array<i64: 1, 128>}, {pipeline_mode = #tpu.pipeline_mode<synchronous>, transform_indices = @transform_5, window_bounds = array<i64: 1, 128>}, {pipeline_mode = #tpu.pipeline_mode<synchronous>, transform_indices = @transform_6, window_bounds = array<i64: 1, 128>}, {pipeline_mode = #tpu.pipeline_mode<synchronous>, transform_indices = @transform_7, window_bounds = array<i64: 1, 128>}, {pipeline_mode = #tpu.pipeline_mode<synchronous>, transform_indices = @transform_8, window_bounds = array<i64: 1, 512>}, {pipeline_mode = #tpu.pipeline_mode<synchronous>, transform_indices = @transform_9, window_bounds = array<i64: 1, 512>}, {transform_indices = @transform_10, window_bounds = array<i64: 1, 8, 8, 512>}]} {
    %c0 = arith.constant 0 : index
    %c0_0 = arith.constant 0 : index
    %c0_1 = arith.constant 0 : index
    %c0_2 = arith.constant 0 : index
    %0 = vector.load %arg1[%c0, %c0_0, %c0_1, %c0_2] : memref<1x8x8x512xbf16, #tpu.memory_space<vmem>>, vector<1x8x8x512xbf16>
    %1 = vector.shape_cast %0 : vector<1x8x8x512xbf16> to vector<8x8x512xbf16>
    %2 = vector.shape_cast %1 : vector<8x8x512xbf16> to vector<64x512xbf16>
    %c0_3 = arith.constant 0 : index
    %c0_4 = arith.constant 0 : index
    %3 = vector.load %arg2[%c0_3, %c0_4] : memref<512x128xbf16, #tpu.memory_space<vmem>>, vector<512x128xbf16>
    %cst = arith.constant dense<0.000000e+00> : vector<64x128xf32>
    %4 = tpu.matmul %2, %3, %cst {dimension_numbers = #tpu.dot_dimension_numbers<[1], [0], [0], [1], [0, 0, 1, 1], [], []>} : vector<64x512xbf16>, vector<512x128xbf16>, vector<64x128xf32> -> vector<64x128xf32>
    %c0_5 = arith.constant 0 : index
    %c0_6 = arith.constant 0 : index
    %5 = vector.load %arg5[%c0_5, %c0_6] : memref<1x128xf32, #tpu.memory_space<vmem>>, vector<1x128xf32>
    %6 = vector.broadcast %5 : vector<1x128xf32> to vector<64x128xf32>
    %7 = arith.mulf %4, %6 : vector<64x128xf32>
    %c0_7 = arith.constant 0 : index
    %c0_8 = arith.constant 0 : index
    %8 = vector.load %arg6[%c0_7, %c0_8] : memref<1x128xf32, #tpu.memory_space<vmem>>, vector<1x128xf32>
    %9 = vector.broadcast %8 : vector<1x128xf32> to vector<64x128xf32>
    %10 = arith.addf %7, %9 : vector<64x128xf32>
    %cst_9 = arith.constant 0.000000e+00 : f32
    %11 = vector.broadcast %cst_9 : f32 to vector<64x128xf32>
    %12 = arith.maximumf %10, %11 : vector<64x128xf32>
    %cst_10 = arith.constant 0.000000e+00 : f32
    %13 = vector.broadcast %cst_10 : f32 to vector<1x10x128xf32>
    %c0_11 = arith.constant 0 : index
    %c0_12 = arith.constant 0 : index
    %c0_13 = arith.constant 0 : index
    %14 = vector.load %arg12[%c0_11, %c0_12, %c0_13] : memref<10x10x128xf32, #tpu.memory_space<vmem>>, vector<1x10x128xf32>
    tpu.vector_store %arg12[%c0_11, %c0_12, %c0_13], %13 {strides = array<i32>} : memref<10x10x128xf32, #tpu.memory_space<vmem>>, vector<1x10x128xf32>,
    %cst_14 = arith.constant 0.000000e+00 : f32
    %15 = vector.broadcast %cst_14 : f32 to vector<1x10x128xf32>
    %c9 = arith.constant 9 : index
    %c0_15 = arith.constant 0 : index
    %c0_16 = arith.constant 0 : index
    %16 = vector.load %arg12[%c9, %c0_15, %c0_16] : memref<10x10x128xf32, #tpu.memory_space<vmem>>, vector<1x10x128xf32>
    tpu.vector_store %arg12[%c9, %c0_15, %c0_16], %15 {strides = array<i32>} : memref<10x10x128xf32, #tpu.memory_space<vmem>>, vector<1x10x128xf32>,
    %cst_17 = arith.constant 0.000000e+00 : f32
    %17 = vector.broadcast %cst_17 : f32 to vector<10x1x128xf32>
    %c0_18 = arith.constant 0 : index
    %c0_19 = arith.constant 0 : index
    %c0_20 = arith.constant 0 : index
    %18 = vector.load %arg12[%c0_18, %c0_19, %c0_20] : memref<10x10x128xf32, #tpu.memory_space<vmem>>, vector<10x1x128xf32>
    tpu.vector_store %arg12[%c0_18, %c0_19, %c0_20], %17 {strides = array<i32>} : memref<10x10x128xf32, #tpu.memory_space<vmem>>, vector<10x1x128xf32>,
    %cst_21 = arith.constant 0.000000e+00 : f32
    %19 = vector.broadcast %cst_21 : f32 to vector<10x1x128xf32>
    %c0_22 = arith.constant 0 : index
    %c9_23 = arith.constant 9 : index
    %c0_24 = arith.constant 0 : index
    %20 = vector.load %arg12[%c0_22, %c9_23, %c0_24] : memref<10x10x128xf32, #tpu.memory_space<vmem>>, vector<10x1x128xf32>
    tpu.vector_store %arg12[%c0_22, %c9_23, %c0_24], %19 {strides = array<i32>} : memref<10x10x128xf32, #tpu.memory_space<vmem>>, vector<10x1x128xf32>,
    %21 = vector.shape_cast %12 : vector<64x128xf32> to vector<8x8x128xf32>
    %c1 = arith.constant 1 : index
    %c1_25 = arith.constant 1 : index
    %c0_26 = arith.constant 0 : index
    %22 = vector.load %arg12[%c1, %c1_25, %c0_26] : memref<10x10x128xf32, #tpu.memory_space<vmem>>, vector<8x8x128xf32>
    tpu.vector_store %arg12[%c1, %c1_25, %c0_26], %21 {strides = array<i32>} : memref<10x10x128xf32, #tpu.memory_space<vmem>>, vector<8x8x128xf32>,
    %c0_27 = arith.constant 0 : index
    %c0_28 = arith.constant 0 : index
    %c0_29 = arith.constant 0 : index
    %23 = vector.load %arg12[%c0_27, %c0_28, %c0_29] : memref<10x10x128xf32, #tpu.memory_space<vmem>>, vector<8x8x128xf32>
    %c0_30 = arith.constant 0 : index
    %c1_31 = arith.constant 1 : index
    %c0_32 = arith.constant 0 : index
    %24 = vector.load %arg12[%c0_30, %c1_31, %c0_32] : memref<10x10x128xf32, #tpu.memory_space<vmem>>, vector<8x8x128xf32>
    %c0_33 = arith.constant 0 : index
    %c2 = arith.constant 2 : index
    %c0_34 = arith.constant 0 : index
    %25 = vector.load %arg12[%c0_33, %c2, %c0_34] : memref<10x10x128xf32, #tpu.memory_space<vmem>>, vector<8x8x128xf32>
    %26 = tpu.concatenate %23, %24, %25 in 2 : vector<8x8x128xf32>, vector<8x8x128xf32>, vector<8x8x128xf32> -> vector<8x8x384xf32>
    %27 = vector.shape_cast %26 : vector<8x8x384xf32> to vector<64x384xf32>
    %28 = arith.truncf %27 : vector<64x384xf32> to vector<64x384xbf16>
    %c0_35 = arith.constant 0 : index
    %c0_36 = arith.constant 0 : index
    %c0_37 = arith.constant 0 : index
    %29 = vector.load %arg3[%c0_35, %c0_36, %c0_37] : memref<3x384x128xbf16, #tpu.memory_space<vmem>>, vector<1x384x128xbf16>
    %30 = vector.shape_cast %29 : vector<1x384x128xbf16> to vector<384x128xbf16>
    %cst_38 = arith.constant dense<0.000000e+00> : vector<64x128xf32>
    %31 = tpu.matmul %28, %30, %cst_38 {dimension_numbers = #tpu.dot_dimension_numbers<[1], [0], [0], [1], [0, 0, 1, 1], [], []>} : vector<64x384xbf16>, vector<384x128xbf16>, vector<64x128xf32> -> vector<64x128xf32>
    %c1_39 = arith.constant 1 : index
    %c0_40 = arith.constant 0 : index
    %c0_41 = arith.constant 0 : index
    %32 = vector.load %arg12[%c1_39, %c0_40, %c0_41] : memref<10x10x128xf32, #tpu.memory_space<vmem>>, vector<8x8x128xf32>
    %c1_42 = arith.constant 1 : index
    %c1_43 = arith.constant 1 : index
    %c0_44 = arith.constant 0 : index
    %33 = vector.load %arg12[%c1_42, %c1_43, %c0_44] : memref<10x10x128xf32, #tpu.memory_space<vmem>>, vector<8x8x128xf32>
    %c1_45 = arith.constant 1 : index
    %c2_46 = arith.constant 2 : index
    %c0_47 = arith.constant 0 : index
    %34 = vector.load %arg12[%c1_45, %c2_46, %c0_47] : memref<10x10x128xf32, #tpu.memory_space<vmem>>, vector<8x8x128xf32>
    %35 = tpu.concatenate %32, %33, %34 in 2 : vector<8x8x128xf32>, vector<8x8x128xf32>, vector<8x8x128xf32> -> vector<8x8x384xf32>
    %36 = vector.shape_cast %35 : vector<8x8x384xf32> to vector<64x384xf32>
    %37 = arith.truncf %36 : vector<64x384xf32> to vector<64x384xbf16>
    %c1_48 = arith.constant 1 : index
    %c0_49 = arith.constant 0 : index
    %c0_50 = arith.constant 0 : index
    %38 = vector.load %arg3[%c1_48, %c0_49, %c0_50] : memref<3x384x128xbf16, #tpu.memory_space<vmem>>, vector<1x384x128xbf16>
    %39 = vector.shape_cast %38 : vector<1x384x128xbf16> to vector<384x128xbf16>
    %cst_51 = arith.constant dense<0.000000e+00> : vector<64x128xf32>
    %40 = tpu.matmul %37, %39, %cst_51 {dimension_numbers = #tpu.dot_dimension_numbers<[1], [0], [0], [1], [0, 0, 1, 1], [], []>} : vector<64x384xbf16>, vector<384x128xbf16>, vector<64x128xf32> -> vector<64x128xf32>
    %41 = arith.addf %31, %40 : vector<64x128xf32>
    %c2_52 = arith.constant 2 : index
    %c0_53 = arith.constant 0 : index
    %c0_54 = arith.constant 0 : index
    %42 = vector.load %arg12[%c2_52, %c0_53, %c0_54] : memref<10x10x128xf32, #tpu.memory_space<vmem>>, vector<8x8x128xf32>
    %c2_55 = arith.constant 2 : index
    %c1_56 = arith.constant 1 : index
    %c0_57 = arith.constant 0 : index
    %43 = vector.load %arg12[%c2_55, %c1_56, %c0_57] : memref<10x10x128xf32, #tpu.memory_space<vmem>>, vector<8x8x128xf32>
    %c2_58 = arith.constant 2 : index
    %c2_59 = arith.constant 2 : index
    %c0_60 = arith.constant 0 : index
    %44 = vector.load %arg12[%c2_58, %c2_59, %c0_60] : memref<10x10x128xf32, #tpu.memory_space<vmem>>, vector<8x8x128xf32>
    %45 = tpu.concatenate %42, %43, %44 in 2 : vector<8x8x128xf32>, vector<8x8x128xf32>, vector<8x8x128xf32> -> vector<8x8x384xf32>
    %46 = vector.shape_cast %45 : vector<8x8x384xf32> to vector<64x384xf32>
    %47 = arith.truncf %46 : vector<64x384xf32> to vector<64x384xbf16>
    %c2_61 = arith.constant 2 : index
    %c0_62 = arith.constant 0 : index
    %c0_63 = arith.constant 0 : index
    %48 = vector.load %arg3[%c2_61, %c0_62, %c0_63] : memref<3x384x128xbf16, #tpu.memory_space<vmem>>, vector<1x384x128xbf16>
    %49 = vector.shape_cast %48 : vector<1x384x128xbf16> to vector<384x128xbf16>
    %cst_64 = arith.constant dense<0.000000e+00> : vector<64x128xf32>
    %50 = tpu.matmul %47, %49, %cst_64 {dimension_numbers = #tpu.dot_dimension_numbers<[1], [0], [0], [1], [0, 0, 1, 1], [], []>} : vector<64x384xbf16>, vector<384x128xbf16>, vector<64x128xf32> -> vector<64x128xf32>
    %51 = arith.addf %41, %50 : vector<64x128xf32>
    %c0_65 = arith.constant 0 : index
    %c0_66 = arith.constant 0 : index
    %52 = vector.load %arg7[%c0_65, %c0_66] : memref<1x128xf32, #tpu.memory_space<vmem>>, vector<1x128xf32>
    %53 = vector.broadcast %52 : vector<1x128xf32> to vector<64x128xf32>
    %54 = arith.mulf %51, %53 : vector<64x128xf32>
    %c0_67 = arith.constant 0 : index
    %c0_68 = arith.constant 0 : index
    %55 = vector.load %arg8[%c0_67, %c0_68] : memref<1x128xf32, #tpu.memory_space<vmem>>, vector<1x128xf32>
    %56 = vector.broadcast %55 : vector<1x128xf32> to vector<64x128xf32>
    %57 = arith.addf %54, %56 : vector<64x128xf32>
    %cst_69 = arith.constant 0.000000e+00 : f32
    %58 = vector.broadcast %cst_69 : f32 to vector<64x128xf32>
    %59 = arith.maximumf %57, %58 : vector<64x128xf32>
    %60 = arith.truncf %59 : vector<64x128xf32> to vector<64x128xbf16>
    %c0_70 = arith.constant 0 : index
    %c0_71 = arith.constant 0 : index
    %61 = vector.load %arg4[%c0_70, %c0_71] : memref<128x512xbf16, #tpu.memory_space<vmem>>, vector<128x512xbf16>
    %cst_72 = arith.constant dense<0.000000e+00> : vector<64x512xf32>
    %62 = tpu.matmul %60, %61, %cst_72 {dimension_numbers = #tpu.dot_dimension_numbers<[1], [0], [0], [1], [0, 0, 1, 1], [], []>} : vector<64x128xbf16>, vector<128x512xbf16>, vector<64x512xf32> -> vector<64x512xf32>
    %c0_73 = arith.constant 0 : index
    %c0_74 = arith.constant 0 : index
    %63 = vector.load %arg9[%c0_73, %c0_74] : memref<1x512xf32, #tpu.memory_space<vmem>>, vector<1x512xf32>
    %64 = vector.broadcast %63 : vector<1x512xf32> to vector<64x512xf32>
    %65 = arith.mulf %62, %64 : vector<64x512xf32>
    %c0_75 = arith.constant 0 : index
    %c0_76 = arith.constant 0 : index
    %66 = vector.load %arg10[%c0_75, %c0_76] : memref<1x512xf32, #tpu.memory_space<vmem>>, vector<1x512xf32>
    %67 = vector.broadcast %66 : vector<1x512xf32> to vector<64x512xf32>
    %68 = arith.addf %65, %67 : vector<64x512xf32>
    %69 = arith.extf %2 : vector<64x512xbf16> to vector<64x512xf32>
    %70 = arith.addf %68, %69 : vector<64x512xf32>
    %cst_77 = arith.constant 0.000000e+00 : f32
    %71 = vector.broadcast %cst_77 : f32 to vector<64x512xf32>
    %72 = arith.maximumf %70, %71 : vector<64x512xf32>
    %73 = arith.truncf %72 : vector<64x512xf32> to vector<64x512xbf16>
    %74 = vector.shape_cast %73 : vector<64x512xbf16> to vector<8x8x512xbf16>
    %c0_78 = arith.constant 0 : index
    %c0_79 = arith.constant 0 : index
    %c0_80 = arith.constant 0 : index
    %c0_81 = arith.constant 0 : index
    %75 = vector.load %arg11[%c0_78, %c0_79, %c0_80, %c0_81] : memref<1x8x8x512xbf16, #tpu.memory_space<vmem>>, vector<1x8x8x512xbf16>
    %76 = vector.shape_cast %75 : vector<1x8x8x512xbf16> to vector<8x8x512xbf16>
    %77 = vector.shape_cast %74 : vector<8x8x512xbf16> to vector<1x8x8x512xbf16>
    tpu.vector_store %arg11[%c0_78, %c0_79, %c0_80, %c0_81], %77 {strides = array<i32>} : memref<1x8x8x512xbf16, #tpu.memory_space<vmem>>, vector<1x8x8x512xbf16>,
    return
  }
  func.func @transform_0(%arg0: i32) -> (i32, i32, i32, i32) {
    %c0_i32 = arith.constant 0 : i32
    %c0_i32_0 = arith.constant 0 : i32
    %c0_i32_1 = arith.constant 0 : i32
    %c0_i32_2 = arith.constant 0 : i32
    return %arg0, %c0_i32, %c0_i32_0, %c0_i32_1 : i32, i32, i32, i32
  }
  func.func @transform_1(%arg0: i32) -> (i32, i32) {
    %c0_i32 = arith.constant 0 : i32
    %c0_i32_0 = arith.constant 0 : i32
    %c0_i32_1 = arith.constant 0 : i32
    return %c0_i32, %c0_i32_0 : i32, i32
  }
  func.func @transform_2(%arg0: i32) -> (i32, i32, i32) {
    %c0_i32 = arith.constant 0 : i32
    %c0_i32_0 = arith.constant 0 : i32
    %c0_i32_1 = arith.constant 0 : i32
    %c0_i32_2 = arith.constant 0 : i32
    return %c0_i32, %c0_i32_0, %c0_i32_1 : i32, i32, i32
  }
  func.func @transform_3(%arg0: i32) -> (i32, i32) {
    %c0_i32 = arith.constant 0 : i32
    %c0_i32_0 = arith.constant 0 : i32
    %c0_i32_1 = arith.constant 0 : i32
    return %c0_i32, %c0_i32_0 : i32, i32
  }
  func.func @transform_4(%arg0: i32) -> (i32, i32) {
    %c0_i32 = arith.constant 0 : i32
    %c0_i32_0 = arith.constant 0 : i32
    %c0_i32_1 = arith.constant 0 : i32
    return %c0_i32, %c0_i32_0 : i32, i32
  }
  func.func @transform_5(%arg0: i32) -> (i32, i32) {
    %c0_i32 = arith.constant 0 : i32
    %c0_i32_0 = arith.constant 0 : i32
    %c0_i32_1 = arith.constant 0 : i32
    return %c0_i32, %c0_i32_0 : i32, i32
  }
  func.func @transform_6(%arg0: i32) -> (i32, i32) {
    %c0_i32 = arith.constant 0 : i32
    %c0_i32_0 = arith.constant 0 : i32
    %c0_i32_1 = arith.constant 0 : i32
    return %c0_i32, %c0_i32_0 : i32, i32
  }
  func.func @transform_7(%arg0: i32) -> (i32, i32) {
    %c0_i32 = arith.constant 0 : i32
    %c0_i32_0 = arith.constant 0 : i32
    %c0_i32_1 = arith.constant 0 : i32
    return %c0_i32, %c0_i32_0 : i32, i32
  }
  func.func @transform_8(%arg0: i32) -> (i32, i32) {
    %c0_i32 = arith.constant 0 : i32
    %c0_i32_0 = arith.constant 0 : i32
    %c0_i32_1 = arith.constant 0 : i32
    return %c0_i32, %c0_i32_0 : i32, i32
  }
  func.func @transform_9(%arg0: i32) -> (i32, i32) {
    %c0_i32 = arith.constant 0 : i32
    %c0_i32_0 = arith.constant 0 : i32
    %c0_i32_1 = arith.constant 0 : i32
    return %c0_i32, %c0_i32_0 : i32, i32
  }
  func.func @transform_10(%arg0: i32) -> (i32, i32, i32, i32) {
    %c0_i32 = arith.constant 0 : i32
    %c0_i32_0 = arith.constant 0 : i32
    %c0_i32_1 = arith.constant 0 : i32
    %c0_i32_2 = arith.constant 0 : i32
    return %arg0, %c0_i32, %c0_i32_0, %c0_i32_1 : i32, i32, i32, i32
  }
}

</mosaic_0001>

<bundles_post_ra>
// kernel: tpu_custom_call.1
= control target key start
LH: loop header
LB: loop body
LE: loop exit
PB: predicated region body
PF: predicated region fallthrough
CT: control target
= control target key end

     0   :  { %s4651_s0 = inlined_call_operand.hbm [shape: bf16[2,8,8,512], index: 0, kind: input, shape index: {}]   ;;  %s4652_s1 = inlined_call_operand.hbm [shape: bf16[512,128], index: 1, kind: input, shape index: {}]   ;;  %s4653_s2 = inlined_call_operand.hbm [shape: bf16[3,384,128], index: 2, kind: input, shape index: {}]   ;;  %s4654_s3 = inlined_call_operand.hbm [shape: bf16[128,512], index: 3, kind: input, shape index: {}]   ;;  %s4655_s4 = inlined_call_operand.vmem [shape: f32[1,128], index: 4, kind: input, shape index: {}]   ;;  %s4656_s5 = inlined_call_operand.vmem [shape: f32[1,128], index: 5, kind: input, shape index: {}]   ;;  %s4657_s6 = inlined_call_operand.vmem [shape: f32[1,128], index: 6, kind: input, shape index: {}]   ;;  %s4658_s7 = inlined_call_operand.vmem [shape: f32[1,128], index: 7, kind: input, shape index: {}]   ;;  %s4659_s8 = inlined_call_operand.vmem [shape: f32[1,512], index: 8, kind: input, shape index: {}]   ;;  %s4660_s9 = inlined_call_operand.vmem [shape: f32[1,512], index: 9, kind: input, shape index: {}]   ;;  %s4661_s10 = inlined_call_operand.hbm [shape: bf16[2,8,8,512], index: 10, kind: output, shape index: {}]  }
   0x1   :  { %4668 = sst [smem:[#allocation18_spill]] %s4660_s9 }
   0x2   :  { %4669 = sst [smem:[#allocation19_spill]] %s4661_s10 }
   0x3   :  { %15 = vsyncpa [#allocation4], 0 }
   0x4   :  { %17 = vsyncpa [#allocation4 + $0x1], 0 }
   0x5   :  { %18 = vsyncpa [#allocation7], 0 }
   0x6   :  { %19 = vsyncpa [#allocation10], 0 }
   0x7   :  { %20 = vsyncpa [#allocation5], 0 }
   0x8   :  { %22 = vsyncpa [#allocation5 + $0x1], 0  ;;  %s3959_s13 = smov 0   ;;  %s3961_s14 = smov 0  }
   0x9   :  { %s3963_s15 = smov 0   ;;  %s3965_s16 = smov 0  }
   0xa LB: > { %4670 = sst [smem:[#allocation16_spill]] %s3877_s13  ;;  %s3980_s17 = sadd.s32 4294967295, %s3889_s16   ;;  %s3889_s16 = sphi %s3965_s16, %s4705_s16   ;;  %s3885_s15 = sphi %s3963_s15, %s4704_s15   ;;  %s3881_s14 = sphi %s3961_s14, %s4703_s14   ;;  %s3877_s13 = sphi %s3959_s13, %s4702_s13  }
   0xb   : > { %s2874_s18 = sadd.s32 4294967294, %s3889_s16   ;;  %p48_p0 = scmp.ne.s32.totalorder %s3881_s14, %s3877_s13 }
   0xc   : > { %p4662_p1 = scmp.eq.s32.totalorder %s3980_s17, 0  ;;  %p267_p3 = scmp.eq.s32.totalorder %s2874_s18, 1 }
   0xd   : > { %p2875_p5 = scmp.ge.s32.totalorder %s3889_s16, 1  ;;  %p274_p7 = scmp.lt.s32.totalorder %s3889_s16, 3 }
   0xe   : > { %p3989_p4 = por %p4662_p1, %p48_p0  ;;  %p3994_p6 = por %p267_p3, %p48_p0 }
   0xf   : > { %p3999_p8 = pnand %p2875_p5, %p274_p7  ;;  %s3891_s22 = smov [#allocation6]  }
  0x10   : > { %s4671_s19 = scalar_select %p3989_p4, 1, 0 }
  0x11   : > { %s4672_s20 = scalar_select %p3994_p6, 1, 0 }
  0x12   : > { %s4674_s21 = scalar_select %p3999_p8, 1, 0 }
  0x13   : > { %4673 = sst [smem:[#allocation17_spill]] %s4672_s20  ;;  %s286_s23 = sshll.u32 %s3891_s22, 4  ;;  %s4003_s23 = int_to_ptr.vmem [resolvable:$true] %s286_s23 }
  0x14   : > { %p3448_p9 = pneg %p3999_p8  ;;  %s3892_s25 = smov [#allocation8]  }
  0x15   : > { %s299_s26 = sshll.u32 %s3892_s25, 4  ;;  %s3893_s27 = smov [#allocation9]   ;;  %s4014_s26 = int_to_ptr.vmem [resolvable:$true] %s299_s26 }
  0x16   : > { %p4010_p11 = pnand %p3448_p9, %p4662_p1  ;;  %s4016_s28 = sshll.u32 %s3893_s27, 4  ;;  %s313_s28 = int_to_ptr.vmem [resolvable:$true] %s4016_s28 }
  0x17   : > { %s3701_s11 = scalar_lea.hbm %s4652_s1, 4096 }
  0x18   : > { %p3702_p12 = scmp.ne.s32.totalorder %s4652_s1, %s3701_s11  ;;  %p4026_p13 = pneg %p4010_p11 }
  0x19   : > { %p3708_p5 = scmp.lt.u32.totalorder %s3701_s11, %s4652_s1 }
  0x1a   : > { %p3704_p0 = pnand %p4026_p13, %p3702_p12 }
  0x1c   : > { %p3705_p3 = pneg %p3704_p0 }
  0x1e   : > { %p3710_p7 = pnand %p3708_p5, %p3705_p3 }
  0x20   : > { %3713 = shalt.err (!%p3710_p7)
}
  0x21   : > { %s3714_s29 = scalar_lea.vmem %s4003_s23, 4096  ;;  %p3722_p2 = scmp.lt.s32.totalorder %s4003_s23, %s4003_s23 }
  0x22   : > { %p3715_p9 = scmp.ne.s32.totalorder %s4003_s23, %s3714_s29  ;;  %p3723_p6 = scmp.lt.s32.totalorder %s3714_s29, %s3714_s29 }
  0x24   : > { %p3717_p10 = pnand %p3715_p9, %p4026_p13  ;;  %p3724_p12 = por %p3723_p6, %p3722_p2 }
  0x26   : > { %p3718_p1 = pneg %p3717_p10 }
  0x28   : > { %p3725_p0 = pnand %p3724_p12, %p3718_p1 }
  0x2a   : > { %3728 = shalt.err (!%p3725_p0)
}
  0x2b   : > { %s3894_s30 = smov 64   ;;  %s3895_s11 = smov 4  }
  0x2c   : > { %3451 = dma.hbm_to_vmem [thread:$0]  (!%p4010_p11), %s4652_s1, 4096, %s4003_s23, [#allocation7], %s3894_s30, %s3894_s30, %s3895_s11  }
  0x2d   : > { %s3729_s20 = scalar_lea.hbm %s4653_s2, 9216 }
  0x2e   : > { %p3730_p2 = scmp.ne.s32.totalorder %s4653_s2, %s3729_s20  ;;  %p3736_p10 = scmp.lt.u32.totalorder %s3729_s20, %s4653_s2 }
  0x30   : > { %p3732_p1 = pnand %p3730_p2, %p4026_p13 }
  0x32   : > { %p3733_p6 = pneg %p3732_p1 }
  0x34   : > { %p3738_p3 = pnand %p3736_p10, %p3733_p6 }
  0x36   : > { %3741 = shalt.err (!%p3738_p3)
}
  0x37   : > { %s3742_s23 = scalar_lea.vmem %s4014_s26, 9216  ;;  %p3750_p12 = scmp.lt.s32.totalorder %s4014_s26, %s4014_s26 }
  0x38   : > { %p3743_p5 = scmp.ne.s32.totalorder %s4014_s26, %s3742_s23  ;;  %p3751_p0 = scmp.lt.s32.totalorder %s3742_s23, %s3742_s23 }
  0x3a   : > { %p3745_p7 = pnand %p3743_p5, %p4026_p13  ;;  %p3752_p2 = por %p3751_p0, %p3750_p12 }
  0x3c   : > { %p3746_p9 = pneg %p3745_p7 }
  0x3e   : > { %p3753_p1 = pnand %p3752_p2, %p3746_p9 }
  0x40   : > { %3756 = shalt.err (!%p3753_p1)
}
  0x41   : > { %3454 = dma.hbm_to_vmem [thread:$0]  (!%p4010_p11), %s4653_s2, 9216, %s4014_s26, [#allocation7], %s3894_s30, %s3894_s30, %s3895_s11  }
  0x42   : > { %s3757_s12 = scalar_lea.hbm %s4654_s3, 4096 }
  0x43   : > { %p3758_p6 = scmp.ne.s32.totalorder %s4654_s3, %s3757_s12  ;;  %p3764_p5 = scmp.lt.u32.totalorder %s3757_s12, %s4654_s3 }
  0x45   : > { %p3760_p10 = pnand %p3758_p6, %p4026_p13 }
  0x47   : > { %p3761_p3 = pneg %p3760_p10 }
  0x49   : > { %p3766_p7 = pnand %p3764_p5, %p3761_p3 }
  0x4b   : > { %3769 = shalt.err (!%p3766_p7)
}
  0x4c   : > { %s3770_s23 = scalar_lea.vmem %s313_s28, 4096  ;;  %p3778_p2 = scmp.lt.s32.totalorder %s313_s28, %s313_s28 }
  0x4d   : > { %p3771_p9 = scmp.ne.s32.totalorder %s313_s28, %s3770_s23  ;;  %p3779_p1 = scmp.lt.s32.totalorder %s3770_s23, %s3770_s23 }
  0x4f   : > { %p3773_p12 = pnand %p3771_p9, %p4026_p13  ;;  %p3780_p4 = por %p3779_p1, %p3778_p2 }
  0x51   : > { %p3774_p0 = pneg %p3773_p12 }
  0x53   : > { %p3781_p8 = pnand %p3780_p4, %p3774_p0 }
  0x55   : > { %3784 = shalt.err (!%p3781_p8)
}
  0x56   : > { %s3896_s26 = smov 256   ;;  %s3897_s22 = smov 16  }
  0x57   : > { %3457 = dma.hbm_to_vmem [thread:$0]  (!%p4010_p11), %s4654_s3, 4096, %s313_s28, [#allocation10], %s3896_s26, %s3896_s26, %s3897_s22  }
  0x58   : > { %s4093_s9 = sadd.s32 1, %s3889_s16   ;;  %s35_s13 = sadd.s32 1, %s3885_s15 }
  0x59   : > { %s32_s10 = ssub.s32 %s3889_s16, %s4093_s9  ;;  %p42_p8 = scmp.ne.s32.totalorder %s3885_s15, %s3881_s14 }
  0x5a   : > { %p33_p4 = scmp.eq.s32.totalorder %s32_s10, 0  ;;  %p43_p13 = scmp.eq.s32.totalorder %s3889_s16, 0 }
  0x5b   : > { %p3469_p6 = scmp.lt.s32.totalorder %s3889_s16, 2  ;;  %p4677_p3 = scmp.eq.s32.totalorder %s3980_s17, 1 }
  0x5c   : > { %s4103_s20 = scalar_select %p33_p4, %s3885_s15, %s35_s13  }
  0x5d   : > { %p44_p10 = por %p43_p13, %p42_p8  ;;  %p4107_p5 = por %p4677_p3, %p42_p8 }
  0x5e   : > { %s344_s12 = sand.u32 1, %s3885_s15   ;;  %s3066_s18 = sshll.u32 %s3889_s16, 11 }
  0x5f   : > { %s2880_s28 = sshll.u32 %s344_s12, 7  ;;  %s4116_s29 = scalar_lea.hbm %s4651_s0, %s3066_s18 }
  0x60   : > { %s348_s23 = scalar_lea.vmem [#allocation3], %s2880_s28  ;;  %p4118_p11 = pnand %p3469_p6, %p44_p10 }
  0x61   : > { %s355_s30 = sshll.u32 %s348_s23, 4  ;;  %s4124_s10 = scalar_lea.sflag [#allocation4], %s344_s12  ;;  %s4122_s30 = int_to_ptr.vmem [resolvable:$true] %s355_s30 }
  0x62   : > { %s3785_s13 = scalar_lea.hbm %s4116_s29, 2048  ;;  %p3787_p9 = pneg %p4118_p11 }
  0x63   : > { %p3786_p7 = scmp.ne.s32.totalorder %s4116_s29, %s3785_s13  ;;  %s3790_s25 = scalar_lea.hbm %s4651_s0, 4096 }
  0x64   : > { %p3791_p2 = scmp.lt.u32.totalorder %s4116_s29, %s4651_s0  ;;  %p3792_p1 = scmp.lt.u32.totalorder %s3790_s25, %s3785_s13 }
  0x65   : > { %p3788_p12 = pnand %p3787_p9, %p3786_p7  ;;  %p3794_p8 = scmp.lt.u32.totalorder %s3785_s13, %s4116_s29 }
  0x66   : > { %p3793_p4 = por %p3792_p1, %p3791_p2 }
  0x67   : > { %p3789_p0 = pneg %p3788_p12 }
  0x68   : > { %p3795_p13 = por %p3794_p8, %p3793_p4 }
  0x6a   : > { %p3796_p6 = pnand %p3795_p13, %p3789_p0 }
  0x6c   : > { %3799 = shalt.err (!%p3796_p6)
}
  0x6d   : > { %s3800_s12 = scalar_lea.vmem %s4122_s30, 2048  ;;  %s3898_s18 = smov [#allocation3]  }
  0x6e   : > { %p3801_p10 = scmp.ne.s32.totalorder %s4122_s30, %s3800_s12  ;;  %s3805_s28 = sshll.u32 %s3898_s18, 4  ;;  %s3806_s28 = int_to_ptr.vmem [resolvable:$false] %s3805_s28 }
  0x6f   : > { %s3807_s27 = scalar_lea.vmem %s3806_s28, 4096  ;;  %p3808_p12 = scmp.lt.s32.totalorder %s4122_s30, %s3806_s28 }
  0x70   : > { %p3803_p3 = pnand %p3801_p10, %p3787_p9  ;;  %p3809_p2 = scmp.lt.s32.totalorder %s3807_s27, %s3800_s12 }
  0x72   : > { %p3804_p7 = pneg %p3803_p3  ;;  %p3810_p1 = por %p3809_p2, %p3808_p12 }
  0x74   : > { %p3811_p4 = pnand %p3810_p1, %p3804_p7 }
  0x76   : > { %3814 = shalt.err (!%p3811_p4)
}
  0x77   : > { %3461 = dma.hbm_to_vmem [thread:$0]  (!%p4118_p11), %s4116_s29, 2048, %s4122_s30, %s4124_s10, %s3896_s26, %s3896_s26, %s3897_s22  }
  0x78   : > { %p4680_p9 = scmp.ne.s32.totalorder %s4674_s21, 0 }
  0x79   : > { %s4158_s13 = sand.u32 (!%p4680_p9), 1, %s3881_s14   ;;  %p4681_p0 = scmp.ne.s32.totalorder (!%p4680_p9), %s4671_s19, 0 }
  0x7a   : > { %367 = sbr.rel (%p4680_p9) target bundleno = 975 (0x3cf), region = 60  ;;  %s2884_s25 = sshll.u32 (!%p4680_p9), %s4158_s13, 7 }
  0x7b   : > { %s370_s23 = scalar_lea.sflag (!%p4680_p9), [#allocation4], %s4158_s13  ;;  %s4164_s11 = scalar_lea.vmem (!%p4680_p9), [#allocation3], %s2884_s25 }
  0x81   : > { %3860 = dma.done.wait (%p4681_p0), %s370_s23, 2048  }
  0x82   : > { %3862 = vsyncadd (%p4681_p0), %s370_s23, 4294965248  ;;  %p4682_p11 = scmp.eq.s32.totalorder %s3980_s17, 0 }
  0x84   : > { %3864 = dma.done.wait (%p4682_p11), [#allocation7], 13312   ;;  %p4683_p8 = pmov %p4682_p11 }
  0x86   : > { %3866 = vsyncadd (%p4683_p8), [#allocation7], 4294953984  ;;  %p4684_p13 = pmov %p4683_p8 }
  0x87   : > { %p4685_p6 = pmov %p4683_p8 }
  0x88   : > { %3868 = dma.done.wait (%p4684_p13), [#allocation10], 4096  }
  0x89   : > { %3870 = vsyncadd (%p4685_p6), [#allocation10], 4294963200  ;;  %v3517_v0 = vld [vmem:[#allocation6 + $0x40] sm:$0xff]   ;;  %v3521_v4 = vld [vmem:[#allocation6 + $0x48] sm:$0xff]   ;;  %s4686_s19 = sld [smem:[#allocation18_spill]]  ;;  %s4697_s29 = sld [smem:[#allocation19_spill]] }
  0x8a   : > { %v3518_v1 = vld [vmem:[#allocation6 + $0xc0] sm:$0xff]   ;;  %3084 = vmatprep.subr.bf16.mxu0 %v3517_v0  ;;  %v3522_v5 = vld [vmem:[#allocation6 + $0xc8] sm:$0xff]   ;;  %v3525_v8 = vld [vmem:[#allocation6 + $0x50] sm:$0xff]   ;;  %s3901_s12 = smov [#allocation11]  }
  0x8b   : > { %v3519_v2 = vld [vmem:[#allocation6] sm:$0xff]   ;;  %3124 = vmatprep.subr.bf16.mxu1 %v3518_v1  ;;  %v3523_v6 = vld [vmem:[#allocation6 + $0x8] sm:$0xff]   ;;  %v3526_v9 = vld [vmem:[#allocation6 + $0xd0] sm:$0xff]   ;;  %s3819_s18 = sshll.u32 %s3901_s12, 4  ;;  %s3820_s18 = int_to_ptr.vmem [resolvable:$false] %s3819_s18 }
  0x8c   : > { %v3520_v3 = vld [vmem:[#allocation6 + $0x80] sm:$0xff]   ;;  %3085 = vmatpush3.bf16.msra.mxu0 %v3519_v2  ;;  %v3524_v7 = vld [vmem:[#allocation6 + $0x88] sm:$0xff]   ;;  %v3527_v10 = vld [vmem:[#allocation6 + $0x10] sm:$0xff]   ;;  %s3821_s28 = scalar_lea.vmem %s3820_s18, 4096 }
  0x8d   : > { %3125 = vmatpush3.bf16.msra.mxu1 %v3520_v3  ;;  %3086 = vmatprep.subr.bf16.mxu0 %v3521_v4  ;;  %v3528_v11 = vld [vmem:[#allocation6 + $0x90] sm:$0xff]   ;;  %v3529_v12 = vld [vmem:[#allocation6 + $0x58] sm:$0xff]   ;;  %v3533_v16 = vld [vmem:[#allocation6 + $0x60] sm:$0xff]  }
  0x8e   : > { %3126 = vmatprep.subr.bf16.mxu1 %v3522_v5  ;;  %v3530_v13 = vld [vmem:[#allocation6 + $0xd8] sm:$0xff]   ;;  %v3534_v17 = vld [vmem:[#allocation6 + $0xe0] sm:$0xff]   ;;  %v3537_v20 = vld [vmem:[#allocation6 + $0x68] sm:$0xff]  }
  0x8f   : > { %v3531_v14 = vld [vmem:[#allocation6 + $0x18] sm:$0xff]   ;;  %v3535_v18 = vld [vmem:[#allocation6 + $0x20] sm:$0xff]   ;;  %v3538_v21 = vld [vmem:[#allocation6 + $0xe8] sm:$0xff]  }
  0x90   : > { %3087 = vmatpush3.bf16.msra.mxu0 %v3523_v6  ;;  %v3532_v15 = vld [vmem:[#allocation6 + $0x98] sm:$0xff]   ;;  %v3536_v19 = vld [vmem:[#allocation6 + $0xa0] sm:$0xff]   ;;  %v3539_v22 = vld [vmem:[#allocation6 + $0x28] sm:$0xff]  }
  0x91   : > { %3127 = vmatpush3.bf16.msra.mxu1 %v3524_v7  ;;  %3088 = vmatprep.subr.bf16.mxu0 %v3525_v8  ;;  %v3540_v23 = vld [vmem:[#allocation6 + $0xa8] sm:$0xff]   ;;  %v3541_v24 = vld [vmem:[#allocation6 + $0x70] sm:$0xff]   ;;  %v3545_v28 = vld [vmem:[#allocation6 + $0x78] sm:$0xff]  }
  0x92   : > { %3128 = vmatprep.subr.bf16.mxu1 %v3526_v9  ;;  %v3542_v25 = vld [vmem:[#allocation6 + $0xf0] sm:$0xff]   ;;  %v3546_v29 = vld [vmem:[#allocation6 + $0xf8] sm:$0xff]   ;;  %v423_v32 = vld [vmem:[%s4164_s11] sm:$0xff] }
  0x93   : > { %v3543_v26 = vld [vmem:[#allocation6 + $0x30] sm:$0xff]   ;;  %v3547_v30 = vld [vmem:[#allocation6 + $0x38] sm:$0xff]   ;;  %v424_v34 = vld [vmem:[%s4164_s11 + $0x8] sm:$0xff] }
  0x94   : > { %3089 = vmatpush3.bf16.msra.mxu0 %v3527_v10  ;;  %v3544_v27 = vld [vmem:[#allocation6 + $0xb0] sm:$0xff]   ;;  %v3548_v31 = vld [vmem:[#allocation6 + $0xb8] sm:$0xff]   ;;  %v427_v38 = vld [vmem:[%s4164_s11 + $0x20] sm:$0xff]  ;;  %v3899_v10 = vmov 0.0  }
  0x95   : > { %3129 = vmatpush3.bf16.msra.mxu1 %v3528_v11  ;;  %3090 = vmatprep.subr.bf16.mxu0 %v3529_v12  ;;  %v425_v33 = vld [vmem:[%s4164_s11 + $0x10] sm:$0xff]  ;;  %v426_v36 = vld [vmem:[%s4164_s11 + $0x18] sm:$0xff]  ;;  %v428_v43 = vld [vmem:[%s4164_s11 + $0x28] sm:$0xff]  ;;  %959 = vst [vmem:[#allocation2 + $0x19] sm:$0x1] %v3899_v10 }
  0x96   : > { %3130 = vmatprep.subr.bf16.mxu1 %v3530_v13  ;;  %v2890_v35 = vcombine.high %v423_v32, %v425_v33  ;;  %v2889_v37 = vcombine.low %v423_v32, %v425_v33  ;;  %v429_v39 = vld [vmem:[%s4164_s11 + $0x30] sm:$0xff]  ;;  %v2892_v40 = vcombine.high %v424_v34, %v426_v36  ;;  %v2891_v41 = vcombine.low %v424_v34, %v426_v36  ;;  %v430_v44 = vld [vmem:[%s4164_s11 + $0x38] sm:$0xff]  ;;  %v431_v46 = vld [vmem:[%s4164_s11 + $0x40] sm:$0xff] }
  0x97   : > { %v2894_v42 = vcombine.high %v427_v38, %v429_v39  ;;  %v2896_v45 = vcombine.high %v428_v43, %v430_v44  ;;  %v433_v47 = vld [vmem:[%s4164_s11 + $0x50] sm:$0xff]  ;;  %v432_v48 = vld [vmem:[%s4164_s11 + $0x48] sm:$0xff]  ;;  %v434_v49 = vld [vmem:[%s4164_s11 + $0x58] sm:$0xff]  ;;  %v2893_v52 = vcombine.low %v427_v38, %v429_v39  ;;  %v2895_v54 = vcombine.low %v428_v43, %v430_v44  ;;  %960 = vst [vmem:[#allocation2 + $0x29] sm:$0x1] %v3899_v10 }
  0x98   : > { %3091 = vmatpush3.bf16.msra.mxu0 %v3531_v14  ;;  %807 = vmatprep.mubr.bf16.mxu0 %v2890_v35  ;;  %v3565_v50 = vld [vmem:[#allocation8 + $0x100] sm:$0xff]   ;;  %v3567_v53 = vld [vmem:[#allocation8 + $0x108] sm:$0xff]   ;;  %v2898_v55 = vcombine.high %v431_v46, %v433_v47  ;;  %v2900_v57 = vcombine.high %v432_v48, %v434_v49  ;;  %v437_v60 = vld [vmem:[%s4164_s11 + $0x70] sm:$0xff]  ;;  %v2897_v63 = vcombine.low %v431_v46, %v433_v47 }
  0x99   : > { %3131 = vmatpush3.bf16.msra.mxu1 %v3532_v15  ;;  %3092 = vmatprep.subr.bf16.mxu0 %v3533_v16  ;;  %v3566_v51 = vld [vmem:[#allocation8 + $0xc0] sm:$0xff]   ;;  %v3568_v56 = vld [vmem:[#allocation8 + $0xc8] sm:$0xff]   ;;  %v438_v62 = vld [vmem:[%s4164_s11 + $0x78] sm:$0xff]  ;;  %v2899_v0 = vcombine.low %v432_v48, %v434_v49  ;;  %943 = vst [vmem:[#allocation2] sm:$0xff] %v3899_v10 }
  0x9a   : > { %3132 = vmatprep.subr.bf16.mxu1 %v3534_v17  ;;  %872 = vmatprep.mubr.bf16.mxu1 %v2892_v40  ;;  %v3569_v58 = vld [vmem:[#allocation8 + $0x140] sm:$0xff]   ;;  %v436_v61 = vld [vmem:[%s4164_s11 + $0x68] sm:$0xff]  ;;  %v3570_v5 = vld [vmem:[#allocation8 + $0x110] sm:$0xff]   ;;  %944 = vst [vmem:[#allocation2 + $0x8] sm:$0x3] %v3899_v10 }
  0x9b   : > { %v435_v59 = vld [vmem:[%s4164_s11 + $0x60] sm:$0xff]  ;;  %v2904_v2 = vcombine.high %v436_v61, %v438_v62  ;;  %v2903_v4 = vcombine.low %v436_v61, %v438_v62  ;;  %v3571_v6 = vld [vmem:[#allocation8 + $0xd0] sm:$0xff]   ;;  %v3572_v7 = vld [vmem:[#allocation8 + $0x148] sm:$0xff]   ;;  %946 = vst [vmem:[#allocation2 + $0x90] sm:$0xff] %v3899_v10 }
  0x9c   : > { %3093 = vmatpush3.bf16.msra.mxu0 %v3535_v18  ;;  %v2902_v1 = vcombine.high %v435_v59, %v437_v60  ;;  %v2901_v3 = vcombine.low %v435_v59, %v437_v60  ;;  %v3573_v8 = vld [vmem:[#allocation8 + $0x118] sm:$0xff]   ;;  %947 = vst [vmem:[#allocation2 + $0x98] sm:$0x3] %v3899_v10  ;;  %949 = vst [vmem:[#allocation2 + $0x10] sm:$0x1] %v3899_v10  ;;  %v3575_v11 = vld [vmem:[#allocation8 + $0x150] sm:$0xff]  }
  0x9d   : > { %3133 = vmatpush3.bf16.msra.mxu1 %v3536_v19  ;;  %3094 = vmatprep.subr.bf16.mxu0 %v3537_v20  ;;  %v3574_v9 = vld [vmem:[#allocation8 + $0xd8] sm:$0xff]   ;;  %950 = vst [vmem:[#allocation2 + $0x20] sm:$0x1] %v3899_v10  ;;  %951 = vst [vmem:[#allocation2 + $0x30] sm:$0x1] %v3899_v10  ;;  %v3576_v12 = vld [vmem:[#allocation8 + $0x120] sm:$0xff]  }
  0x9e   : > { %3134 = vmatprep.subr.bf16.mxu1 %v3538_v21  ;;  %952 = vst [vmem:[#allocation2 + $0x40] sm:$0x1] %v3899_v10  ;;  %953 = vst [vmem:[#allocation2 + $0x50] sm:$0x1] %v3899_v10  ;;  %v3577_v13 = vld [vmem:[#allocation8 + $0xe0] sm:$0xff]   ;;  %v3578_v14 = vld [vmem:[#allocation8 + $0x158] sm:$0xff]  }
  0x9f   : > { %954 = vst [vmem:[#allocation2 + $0x60] sm:$0x1] %v3899_v10  ;;  %955 = vst [vmem:[#allocation2 + $0x70] sm:$0x1] %v3899_v10  ;;  %v3579_v15 = vld [vmem:[#allocation8 + $0x128] sm:$0xff]   ;;  %v3581_v17 = vld [vmem:[#allocation8 + $0x160] sm:$0xff]  }
  0xa0   : > { %3095 = vmatpush3.bf16.msra.mxu0 %v3539_v22  ;;  %956 = vst [vmem:[#allocation2 + $0x80] sm:$0x1] %v3899_v10  ;;  %961 = vst [vmem:[#allocation2 + $0x39] sm:$0x1] %v3899_v10  ;;  %v3580_v16 = vld [vmem:[#allocation8 + $0xe8] sm:$0xff]   ;;  %v3582_v18 = vld [vmem:[#allocation8 + $0x130] sm:$0xff]  }
  0xa1   : > { %3135 = vmatpush3.bf16.msra.mxu1 %v3540_v23  ;;  %3096 = vmatprep.subr.bf16.mxu0 %v3541_v24  ;;  %962 = vst [vmem:[#allocation2 + $0x49] sm:$0x1] %v3899_v10  ;;  %963 = vst [vmem:[#allocation2 + $0x59] sm:$0x1] %v3899_v10  ;;  %v3583_v19 = vld [vmem:[#allocation8 + $0xf0] sm:$0xff]   ;;  %v3584_v20 = vld [vmem:[#allocation8 + $0x168] sm:$0xff]  }
  0xa2   : > { %3136 = vmatprep.subr.bf16.mxu1 %v3542_v25  ;;  %964 = vst [vmem:[#allocation2 + $0x69] sm:$0x1] %v3899_v10  ;;  %965 = vst [vmem:[#allocation2 + $0x79] sm:$0x1] %v3899_v10  ;;  %v3585_v21 = vld [vmem:[#allocation8 + $0x138] sm:$0xff]   ;;  %v3587_v23 = vld [vmem:[#allocation8 + $0x170] sm:$0xff]  }
  0xa3   : > { %966 = vst [vmem:[#allocation2 + $0x89] sm:$0x1] %v3899_v10  ;;  %948 = vst [vmem:[#allocation2] sm:$0x1] %v3899_v10  ;;  %v3586_v22 = vld [vmem:[#allocation8 + $0xf8] sm:$0xff]   ;;  %v3588_v24 = vld [vmem:[#allocation8 + $0x40] sm:$0xff]  }
  0xa4   : > { %3097 = vmatpush3.bf16.msra.mxu0 %v3543_v26  ;;  %957 = vst [vmem:[#allocation2 + $0x90] sm:$0x1] %v3899_v10  ;;  %958 = vst [vmem:[#allocation2 + $0x9] sm:$0x1] %v3899_v10  ;;  %v3590_v25 = vld [vmem:[#allocation8 + $0x178] sm:$0xff]   ;;  %v4194_v26 = vld [vmem:[#allocation8 + $0x80] sm:$0xff]  }
  0xa5   : > { %3137 = vmatpush3.bf16.msra.mxu1 %v3544_v27  ;;  %3098 = vmatprep.subr.bf16.mxu0 %v3545_v28  ;;  %967 = vst [vmem:[#allocation2 + $0x99] sm:$0x1] %v3899_v10  ;;  %v4200_v36 = vld [vmem:[%s4655_s4] ss:$0 sm:$0xff] }
  0xa6   : > { %3138 = vmatprep.subr.bf16.mxu1 %v3546_v29 }
  0xa8   : > { %3099 = vmatpush3.bf16.msra.mxu0 %v3547_v30 }
  0xa9   : > { %3139 = vmatpush3.bf16.msra.mxu1 %v3548_v31  ;;  %3164 = vmatprep.subr.bf16.mxu0 %v3565_v50 }
  0xaa   : > { %3320 = vmatprep.subr.bf16.mxu1 %v3569_v58 }
  0xab   : > { %808 = vmatmul.mubr.bf16.vlgmr.msra.gmra.mrb[0].mxu0 %v2889_v37 }
  0xac   : > { %873 = vmatmul.mubr.bf16.vlgmr.msra.gmra.mrb[0].mxu1 %v2891_v41  ;;  %815 = vmatprep.mubr.bf16.mxu0 %v2894_v42  ;;  %v4205_v41 = vld [vmem:[%s4656_s5] ss:$0 sm:$0xff] }
  0xad   : > { %880 = vmatprep.mubr.bf16.mxu1 %v2896_v45  ;;  %3165 = vmatpush3.bf16.msra.mxu0 %v3566_v51 }
  0xae   : > { %3166 = vmatprep.subr.bf16.mxu0 %v3567_v53  ;;  %3321 = vmatpush3.bf16.msra.mxu1 %v3569_v58 }
  0xaf   : > { %3322 = vmatprep.subr.bf16.mxu1 %v3572_v7 }
  0xb1   : > { %3167 = vmatpush3.bf16.msra.mxu0 %v3568_v56 }
  0xb2   : > { %3168 = vmatprep.subr.bf16.mxu0 %v3570_v5  ;;  %3323 = vmatpush3.bf16.msra.mxu1 %v3572_v7 }
  0xb3   : > { %816 = vmatmul.mubr.bf16.gmra.mrb[4].mxu0 %v2893_v52  ;;  %3324 = vmatprep.subr.bf16.mxu1 %v3575_v11 }
  0xb4   : > { %881 = vmatmul.mubr.bf16.gmra.mrb[4].mxu1 %v2895_v54  ;;  %823 = vmatprep.mubr.bf16.mxu0 %v2898_v55 }
  0xb5   : > { %888 = vmatprep.mubr.bf16.mxu1 %v2900_v57  ;;  %3169 = vmatpush3.bf16.msra.mxu0 %v3571_v6 }
  0xb6   : > { %3170 = vmatprep.subr.bf16.mxu0 %v3573_v8  ;;  %3325 = vmatpush3.bf16.msra.mxu1 %v3575_v11 }
  0xb7   : > { %3326 = vmatprep.subr.bf16.mxu1 %v3578_v14 }
  0xb9   : > { %3171 = vmatpush3.bf16.msra.mxu0 %v3574_v9 }
  0xba   : > { %3172 = vmatprep.subr.bf16.mxu0 %v3576_v12  ;;  %3327 = vmatpush3.bf16.msra.mxu1 %v3578_v14 }
  0xbb   : > { %824 = vmatmul.mubr.bf16.gmra.mrb[8].mxu0 %v2897_v63  ;;  %3328 = vmatprep.subr.bf16.mxu1 %v3581_v17 }
  0xbc   : > { %889 = vmatmul.mubr.bf16.gmra.mrb[8].mxu1 %v2899_v0  ;;  %831 = vmatprep.mubr.bf16.mxu0 %v2902_v1 }
  0xbd   : > { %896 = vmatprep.mubr.bf16.mxu1 %v2904_v2  ;;  %3173 = vmatpush3.bf16.msra.mxu0 %v3577_v13 }
  0xbe   : > { %3174 = vmatprep.subr.bf16.mxu0 %v3579_v15  ;;  %3329 = vmatpush3.bf16.msra.mxu1 %v3581_v17 }
  0xbf   : > { %3330 = vmatprep.subr.bf16.mxu1 %v3584_v20 }
  0xc1   : > { %3175 = vmatpush3.bf16.msra.mxu0 %v3580_v16 }
  0xc2   : > { %3176 = vmatprep.subr.bf16.mxu0 %v3582_v18  ;;  %3331 = vmatpush3.bf16.msra.mxu1 %v3584_v20  ;;  %v3589_v20 = vld [vmem:[#allocation8] sm:$0xff]  }
  0xc3   : > { %832 = vmatmul.mubr.bf16.gmra.mrb[12].mxu0 %v2901_v3  ;;  %3332 = vmatprep.subr.bf16.mxu1 %v3587_v23 }
  0xc4   : > { %897 = vmatmul.mubr.bf16.gmra.mrb[12].mxu1 %v2903_v4 }
  0xc5   : > { %3177 = vmatpush3.bf16.msra.mxu0 %v3583_v19 }
  0xc6   : > { %3178 = vmatprep.subr.bf16.mxu0 %v3585_v21  ;;  %3333 = vmatpush3.bf16.msra.mxu1 %v3587_v23 }
  0xc7   : > { %3334 = vmatprep.subr.bf16.mxu1 %v3590_v25 }
  0xc9   : > { %3179 = vmatpush3.bf16.msra.mxu0 %v3586_v22 }
  0xca   : > { %3216 = vmatprep.subr.bf16.mxu0 %v3588_v24  ;;  %3335 = vmatpush3.bf16.msra.mxu1 %v3590_v25 }
  0xcb   : > { %3344 = vmatprep.subr.bf16.mxu1 %v4194_v26 }
 0x17e   : > { %v3100_v27 = vpop.f32.mrb[0].mxu0 }
 0x17f   : > { %v3140_v28 = vpop.f32.mrb[0].mxu1  ;;  %v3101_v29 = vpop.f32.mrb[1].mxu0 }
 0x180   : > { %v3102_v30 = vadd.f32 %v3101_v29, %v3100_v27  ;;  %v3141_v31 = vpop.f32.mrb[1].mxu1  ;;  %v3103_v32 = vpop.f32.mrb[2].mxu0 }
 0x181   : > { %v3142_v33 = vadd.f32 %v3141_v31, %v3140_v28  ;;  %v3143_v34 = vpop.f32.mrb[2].mxu1  ;;  %v3104_v35 = vpop.f32.mrb[3].mxu0 }
 0x182   : > { %v3105_v37 = vadd.f32 %v3104_v35, %v3103_v32  ;;  %v3144_v38 = vpop.f32.mrb[3].mxu1 }
 0x183   : > { %v875_v39 = vadd.f32 %v3142_v33, %v3102_v30  ;;  %v3145_v40 = vadd.f32 %v3144_v38, %v3143_v34  ;;  %v3591_v30 = vld [vmem:[#allocation8 + $0x48] sm:$0xff]  }
 0x185   : > { %v912_v42 = vmul.f32 %v4200_v36, %v875_v39  ;;  %v878_v43 = vadd.f32 %v3145_v40, %v3105_v37 }
 0x186   : > { %v3106_v44 = vpop.f32.mrb[4].mxu0 }
 0x187   : > { %v927_v45 = vadd.f32 %v4205_v41, %v912_v42  ;;  %v913_v46 = vmul.f32 %v4200_v36, %v878_v43  ;;  %v3146_v47 = vpop.f32.mrb[4].mxu1  ;;  %v3107_v48 = vpop.f32.mrb[5].mxu0  ;;  %v3592_v42 = vld [vmem:[#allocation8 + $0x8] sm:$0xff]  }
 0x188   : > { %v3108_v49 = vadd.f32 %v3107_v48, %v3106_v44  ;;  %v3147_v50 = vpop.f32.mrb[5].mxu1  ;;  %v3109_v51 = vpop.f32.mrb[6].mxu0  ;;  %v3594_v48 = vld [vmem:[#allocation8 + $0x50] sm:$0xff]  }
 0x189   : > { %v4210_v52 = vmax.f32 %v927_v45, 0.0  ;;  %v928_v53 = vadd.f32 %v4205_v41, %v913_v46  ;;  %v3148_v54 = vadd.f32 %v3147_v50, %v3146_v47  ;;  %v3149_v55 = vpop.f32.mrb[6].mxu1  ;;  %v3110_v56 = vpop.f32.mrb[7].mxu0 }
 0x18a   : > { %v3111_v57 = vadd.f32 %v3110_v56, %v3109_v51  ;;  %v3150_v58 = vpop.f32.mrb[7].mxu1  ;;  %v3595_v56 = vld [vmem:[#allocation8 + $0x10] sm:$0xff]  }
 0x18b   : > { %969 = vst [vmem:[#allocation2 + $0x11] sm:$0xff] %v4210_v52  ;;  %v936_v59 = vmax.f32 %v928_v53, 0.0  ;;  %v883_v60 = vadd.f32 %v3148_v54, %v3108_v49  ;;  %v3151_v61 = vadd.f32 %v3150_v58, %v3149_v55 }
 0x18d   : > { %970 = vst [vmem:[#allocation2 + $0x21] sm:$0xff] %v936_v59  ;;  %v914_v62 = vmul.f32 %v4200_v36, %v883_v60  ;;  %v886_v63 = vadd.f32 %v3151_v61, %v3111_v57  ;;  %v1086_v0 = vpack.c.bf16 %v936_v59, %v4210_v52 }
 0x18e   : > { %v3112_v1 = vpop.f32.mrb[8].mxu0 }
 0x18f   : > { %v929_v2 = vadd.f32 %v4205_v41, %v914_v62  ;;  %v915_v3 = vmul.f32 %v4200_v36, %v886_v63  ;;  %v3152_v4 = vpop.f32.mrb[8].mxu1  ;;  %v3113_v5 = vpop.f32.mrb[9].mxu0  ;;  %1322 = vmatprep.mubr.bf16.mxu0 %v1086_v0 }
 0x190   : > { %v3114_v6 = vadd.f32 %v3113_v5, %v3112_v1  ;;  %v3153_v7 = vpop.f32.mrb[9].mxu1  ;;  %v3115_v8 = vpop.f32.mrb[10].mxu0  ;;  %v3596_v1 = vld [vmem:[#allocation8 + $0x88] sm:$0xff]  }
 0x191   : > { %v937_v9 = vmax.f32 %v929_v2, 0.0  ;;  %v930_v10 = vadd.f32 %v4205_v41, %v915_v3  ;;  %v3154_v11 = vadd.f32 %v3153_v7, %v3152_v4  ;;  %v3155_v12 = vpop.f32.mrb[10].mxu1  ;;  %v3116_v13 = vpop.f32.mrb[11].mxu0  ;;  %v3597_v2 = vld [vmem:[#allocation8 + $0x58] sm:$0xff]  }
 0x192   : > { %v3117_v14 = vadd.f32 %v3116_v13, %v3115_v8  ;;  %v3156_v15 = vpop.f32.mrb[11].mxu1  ;;  %v4219_v19 = vld [vmem:[#allocation2 + $0x12] sm:$0xff] }
 0x193   : > { %971 = vst [vmem:[#allocation2 + $0x31] sm:$0xff] %v937_v9  ;;  %v938_v16 = vmax.f32 %v930_v10, 0.0  ;;  %v891_v17 = vadd.f32 %v3154_v11, %v3114_v6  ;;  %v3157_v18 = vadd.f32 %v3156_v15, %v3155_v12  ;;  %v4223_v22 = vld [vmem:[#allocation2 + $0x10] sm:$0xff]  ;;  %v4227_v24 = vpack.c.bf16 %v937_v9, %v936_v59  ;;  %v3598_v6 = vld [vmem:[#allocation8 + $0x18] sm:$0xff]   ;;  %v3600_v10 = vld [vmem:[#allocation8 + $0x60] sm:$0xff]  }
 0x194   : > { %v4221_v21 = vld [vmem:[#allocation2 + $0x22] sm:$0xff] }
 0x195   : > { %v4225_v23 = vld [vmem:[#allocation2 + $0x20] sm:$0xff]  ;;  %972 = vst [vmem:[#allocation2 + $0x41] sm:$0xff] %v938_v16  ;;  %v916_v25 = vmul.f32 %v4200_v36, %v891_v17  ;;  %v894_v27 = vadd.f32 %v3157_v18, %v3117_v14  ;;  %v1087_v28 = vpack.c.bf16 %v4221_v21, %v4219_v19  ;;  %v1089_v32 = vpack.c.bf16 %v938_v16, %v937_v9  ;;  %v3599_v9 = vld [vmem:[#allocation8 + $0x90] sm:$0xff]   ;;  %v3602_v17 = vld [vmem:[#allocation8 + $0x98] sm:$0xff]  }
 0x196   : > { %v1085_v29 = vpack.c.bf16 %v4225_v23, %v4223_v22  ;;  %v3118_v31 = vpop.f32.mrb[12].mxu0  ;;  %v3603_v18 = vld [vmem:[#allocation8 + $0x68] sm:$0xff]  }
 0x197   : > { %v931_v33 = vadd.f32 %v4205_v41, %v916_v25  ;;  %v917_v34 = vmul.f32 %v4200_v36, %v894_v27  ;;  %v3158_v35 = vpop.f32.mrb[12].mxu1  ;;  %3336 = vmatprep.mubr.bf16.mxu1 %v1087_v28  ;;  %v3119_v37 = vpop.f32.mrb[13].mxu0  ;;  %v3604_v25 = vld [vmem:[#allocation8 + $0x28] sm:$0xff]   ;;  %v3605_v27 = vld [vmem:[#allocation8 + $0xa0] sm:$0xff]   ;;  %v3606_v28 = vld [vmem:[#allocation8 + $0x70] sm:$0xff]  }
 0x198   : > { %1323 = vmatmul.mubr.bf16.vlgmr.msra.gmra.mrb[16].mxu0 %v1085_v29  ;;  %v3120_v38 = vadd.f32 %v3119_v37, %v3118_v31  ;;  %v3159_v39 = vpop.f32.mrb[13].mxu1  ;;  %v3121_v40 = vpop.f32.mrb[14].mxu0  ;;  %v985_v31 = vld [vmem:[#allocation2 + $0x1] sm:$0xff] }
 0x199   : > { %3217 = vmatpush3.bf16.msra.mxu0 %v3589_v20  ;;  %1330 = vmatprep.mubr.bf16.mxu0 %v1089_v32  ;;  %v939_v43 = vmax.f32 %v931_v33, 0.0  ;;  %v932_v44 = vadd.f32 %v4205_v41, %v917_v34  ;;  %v3160_v45 = vadd.f32 %v3159_v39, %v3158_v35  ;;  %v3161_v46 = vpop.f32.mrb[14].mxu1  ;;  %v3122_v47 = vpop.f32.mrb[15].mxu0 }
 0x19a   : > { %3218 = vmatprep.subr.bf16.mxu0 %v3591_v30  ;;  %v3123_v49 = vadd.f32 %v3122_v47, %v3121_v40  ;;  %v3162_v50 = vpop.f32.mrb[15].mxu1  ;;  %v4237_v55 = vld [vmem:[#allocation2 + $0x32] sm:$0xff]  ;;  %v993_v30 = vld [vmem:[#allocation2 + $0x2] sm:$0xff] }
 0x19b   : > { %973 = vst [vmem:[#allocation2 + $0x51] sm:$0xff] %v939_v43  ;;  %v940_v51 = vmax.f32 %v932_v44, 0.0  ;;  %v899_v53 = vadd.f32 %v3160_v45, %v3120_v38  ;;  %v3163_v54 = vadd.f32 %v3162_v50, %v3161_v46  ;;  %v4241_v58 = vld [vmem:[#allocation2 + $0x30] sm:$0xff]  ;;  %v4245_v60 = vpack.c.bf16 %v939_v43, %v938_v16  ;;  %v3608_v40 = vld [vmem:[#allocation8 + $0xa8] sm:$0xff]   ;;  %v3610_v44 = vld [vmem:[#allocation8 + $0x38] sm:$0xff]  }
 0x19c   : > { %v4239_v57 = vld [vmem:[#allocation2 + $0x42] sm:$0xff]  ;;  %v3607_v38 = vld [vmem:[#allocation8 + $0x30] sm:$0xff]   ;;  %v1003_v39 = vpack.c.bf16 %v4219_v19, %v993_v30 }
 0x19d   : > { %3219 = vmatpush3.bf16.msra.mxu0 %v3592_v42  ;;  %v4243_v59 = vld [vmem:[#allocation2 + $0x40] sm:$0xff]  ;;  %974 = vst [vmem:[#allocation2 + $0x61] sm:$0xff] %v940_v51  ;;  %v918_v61 = vmul.f32 %v4200_v36, %v899_v53  ;;  %v902_v62 = vadd.f32 %v3163_v54, %v3123_v49  ;;  %v1090_v63 = vpack.c.bf16 %v4239_v57, %v4237_v55  ;;  %v3609_v42 = vld [vmem:[#allocation8 + $0x78] sm:$0xff]   ;;  %v3611_v45 = vld [vmem:[#allocation8 + $0xb0] sm:$0xff]  }
 0x19e   : > { %v1088_v0 = vpack.c.bf16 %v4243_v59, %v4241_v58  ;;  %3220 = vmatprep.subr.bf16.mxu0 %v3594_v48  ;;  %v1092_v3 = vpack.c.bf16 %v940_v51, %v939_v43  ;;  %v1002_v43 = vpack.c.bf16 %v4210_v52, %v985_v31  ;;  %v3612_v46 = vld [vmem:[#allocation8 + $0x1c0] sm:$0xff]   ;;  %v3614_v49 = vld [vmem:[#allocation8 + $0xb8] sm:$0xff]   ;;  %v3615_v50 = vld [vmem:[#allocation8 + $0x1c8] sm:$0xff]   ;;  %v1006_v54 = vpack.c.bf16 %v4237_v55, %v4221_v21 }
 0x19f   : > { %v933_v4 = vadd.f32 %v4205_v41, %v918_v61  ;;  %v919_v5 = vmul.f32 %v4200_v36, %v902_v62  ;;  %3337 = vmatmul.mubr.bf16.vlgmr.msra.gmra.mrb[16].mxu1 %v1090_v63  ;;  %v3601_v36 = vld [vmem:[#allocation8 + $0x20] sm:$0xff]   ;;  %v3616_v52 = vld [vmem:[#allocation8 + $0x188] sm:$0xff]   ;;  %v3618_v53 = vld [vmem:[#allocation8 + $0x1d0] sm:$0xff]   ;;  %v1004_v62 = vpack.c.bf16 %v4241_v58, %v4225_v23 }
 0x1a0   : > { %1331 = vmatmul.mubr.bf16.gmra.mrb[20].mxu0 %v1088_v0  ;;  %3345 = vmatpush3.bf16.msra.mxu1 %v4194_v26  ;;  %v977_v47 = vld [vmem:[#allocation2] sm:$0xff]  ;;  %v3619_v61 = vld [vmem:[#allocation8 + $0x190] sm:$0xff]   ;;  %v3621_v63 = vld [vmem:[#allocation8 + $0x1d8] sm:$0xff]  }
 0x1a1   : > { %3221 = vmatpush3.bf16.msra.mxu0 %v3595_v56  ;;  %v941_v7 = vmax.f32 %v933_v4, 0.0  ;;  %v934_v8 = vadd.f32 %v4205_v41, %v919_v5  ;;  %3346 = vmatprep.subr.bf16.mxu1 %v3596_v1  ;;  %v3613_v19 = vld [vmem:[#allocation8 + $0x180] sm:$0xff]   ;;  %v1001_v48 = vpack.c.bf16 %v4223_v22, %v977_v47  ;;  %v3620_v22 = vld [vmem:[#allocation8 + $0x208] sm:$0xff]   ;;  %v3623_v0 = vld [vmem:[#allocation8 + $0x210] sm:$0xff]  }
 0x1a2   : > { %3222 = vmatprep.subr.bf16.mxu0 %v3597_v2  ;;  %1338 = vmatprep.mubr.bf16.mxu0 %v1092_v3  ;;  %v4258_v12 = vld [vmem:[#allocation2 + $0x52] sm:$0xff]  ;;  %v3624_v55 = vld [vmem:[#allocation8 + $0x1e0] sm:$0xff]   ;;  %v3627_v2 = vld [vmem:[#allocation8 + $0x1e8] sm:$0xff]  }
 0x1a3   : > { %975 = vst [vmem:[#allocation2 + $0x71] sm:$0xff] %v941_v7  ;;  %v4256_v11 = vmax.f32 %v934_v8, 0.0  ;;  %v4260_v13 = vpack.c.bf16 %v941_v7, %v940_v51  ;;  %v4264_v14 = vld [vmem:[#allocation2 + $0x50] sm:$0xff]  ;;  %v3617_v51 = vld [vmem:[#allocation8 + $0x200] sm:$0xff]   ;;  %v1009_v56 = vpack.c.bf16 %v4258_v12, %v4239_v57  ;;  %v3622_v21 = vld [vmem:[#allocation8 + $0x198] sm:$0xff]  }
 0x1a4   : > { %3347 = vmatpush3.bf16.msra.mxu1 %v3596_v1  ;;  %v4262_v26 = vld [vmem:[#allocation2 + $0x62] sm:$0xff]  ;;  %v3626_v1 = vld [vmem:[#allocation8 + $0x218] sm:$0xff]   ;;  %v1007_v58 = vpack.c.bf16 %v4264_v14, %v4243_v59  ;;  %v3630_v5 = vld [vmem:[#allocation8 + $0x1f0] sm:$0xff]  }
 0x1a5   : > { %3223 = vmatpush3.bf16.msra.mxu0 %v3598_v6  ;;  %v4266_v41 = vld [vmem:[#allocation2 + $0x60] sm:$0xff]  ;;  %976 = vst [vmem:[#allocation2 + $0x81] sm:$0xff] %v4256_v11  ;;  %3348 = vmatprep.subr.bf16.mxu1 %v3599_v9  ;;  %v1093_v15 = vpack.c.bf16 %v4262_v26, %v4258_v12  ;;  %v1095_v20 = vpack.c.bf16 %v4256_v11, %v941_v7  ;;  %v3628_v4 = vld [vmem:[#allocation8 + $0x1a8] sm:$0xff]   ;;  %v3631_v7 = vld [vmem:[#allocation8 + $0x1b0] sm:$0xff]  }
 0x1a6   : > { %v1091_v16 = vpack.c.bf16 %v4266_v41, %v4264_v14  ;;  %3224 = vmatprep.subr.bf16.mxu0 %v3600_v10  ;;  %v3625_v23 = vld [vmem:[#allocation8 + $0x1a0] sm:$0xff]   ;;  %v3632_v6 = vld [vmem:[#allocation8 + $0x228] sm:$0xff]   ;;  %v3633_v8 = vld [vmem:[#allocation8 + $0x1f8] sm:$0xff]  }
 0x1a7   : > { %3340 = vmatprep.mubr.bf16.mxu1 %v1093_v15  ;;  %v3629_v3 = vld [vmem:[#allocation8 + $0x220] sm:$0xff]   ;;  %v3634_v10 = vld [vmem:[#allocation8 + $0x1b8] sm:$0xff]  }
 0x1a8   : > { %1339 = vmatmul.mubr.bf16.gmra.mrb[24].mxu0 %v1091_v16  ;;  %3349 = vmatpush3.bf16.msra.mxu1 %v3599_v9  ;;  %v3635_v9 = vld [vmem:[#allocation8 + $0x230] sm:$0xff]   ;;  %v3636_v12 = vld [vmem:[#allocation8 + $0x238] sm:$0xff]  }
 0x1a9   : > { %3225 = vmatpush3.bf16.msra.mxu0 %v3601_v36  ;;  %3350 = vmatprep.subr.bf16.mxu1 %v3602_v17  ;;  %v1718_v36 = vld [vmem:[#allocation2 + $0x92] sm:$0xff]  ;;  %v3642_v16 = vld [vmem:[#allocation9 + $0xc] ss:$16 sps:$4 sm:$0xff]  }
 0x1aa   : > { %3226 = vmatprep.subr.bf16.mxu0 %v3603_v18  ;;  %1346 = vmatprep.mubr.bf16.mxu0 %v1095_v20  ;;  %v4274_v29 = vld [vmem:[#allocation2 + $0x72] sm:$0xff] }
 0x1ab   : > { %v4278_v33 = vld [vmem:[#allocation2 + $0x70] sm:$0xff]  ;;  %v1012_v57 = vpack.c.bf16 %v4274_v29, %v4262_v26  ;;  %v3640_v18 = vld [vmem:[#allocation9 + $0x8] ss:$16 sps:$4 sm:$0xff]  }
 0x1ac   : > { %3351 = vmatpush3.bf16.msra.mxu1 %v3602_v17  ;;  %v4276_v32 = vld [vmem:[#allocation2 + $0x82] sm:$0xff]  ;;  %v1010_v59 = vpack.c.bf16 %v4278_v33, %v4266_v41  ;;  %v1710_v26 = vld [vmem:[#allocation2 + $0x91] sm:$0xff] }
 0x1ad   : > { %3227 = vmatpush3.bf16.msra.mxu0 %v3604_v25  ;;  %v4280_v34 = vld [vmem:[#allocation2 + $0x80] sm:$0xff]  ;;  %3352 = vmatprep.subr.bf16.mxu1 %v3605_v27  ;;  %v1096_v35 = vpack.c.bf16 %v4276_v32, %v4274_v29  ;;  %v1729_v14 = vpack.c.bf16 %v1710_v26, %v4256_v11  ;;  %v1702_v41 = vld [vmem:[#allocation2 + $0x90] sm:$0xff]  ;;  %v3648_v25 = vld [vmem:[#allocation9 + $0x2c] ss:$16 sps:$4 sm:$0xff]  }
 0x1ae   : > { %v1094_v37 = vpack.c.bf16 %v4280_v34, %v4278_v33  ;;  %3228 = vmatprep.subr.bf16.mxu0 %v3606_v28  ;;  %v1728_v15 = vpack.c.bf16 %v1702_v41, %v4280_v34  ;;  %v3637_v17 = vld [vmem:[#allocation9] ss:$16 sps:$4 sm:$0xff]   ;;  %v3645_v20 = vld [vmem:[#allocation9 + $0x24] ss:$16 sps:$4 sm:$0xff]   ;;  %v3654_v28 = vld [vmem:[#allocation9 + $0x4c] ss:$16 sps:$4 sm:$0xff]  }
 0x1af   : > { %3341 = vmatmul.mubr.bf16.gmra.mrb[20].mxu1 %v1096_v35  ;;  %v3651_v11 = vld [vmem:[#allocation9 + $0x44] ss:$16 sps:$4 sm:$0xff]   ;;  %v3649_v29 = vld [vmem:[#allocation9 + $0x40] ss:$16 sps:$4 sm:$0xff]   ;;  %v3652_v30 = vld [vmem:[#allocation9 + $0x48] ss:$16 sps:$4 sm:$0xff]  }
 0x1b0   : > { %1347 = vmatmul.mubr.bf16.gmra.mrb[28].mxu0 %v1094_v37  ;;  %3353 = vmatpush3.bf16.msra.mxu1 %v3605_v27  ;;  %v3646_v27 = vld [vmem:[#allocation9 + $0x28] ss:$16 sps:$4 sm:$0xff]   ;;  %v3655_v31 = vld [vmem:[#allocation9 + $0x60] ss:$16 sps:$4 sm:$0xff]   ;;  %v3660_v33 = vld [vmem:[#allocation9 + $0x6c] ss:$16 sps:$4 sm:$0xff]  }
 0x1b1   : > { %3360 = vmatprep.mubr.bf16.mxu1 %v1003_v39  ;;  %3229 = vmatpush3.bf16.msra.mxu0 %v3607_v38  ;;  %v3658_v34 = vld [vmem:[#allocation9 + $0x68] ss:$16 sps:$4 sm:$0xff]   ;;  %v3663_v35 = vld [vmem:[#allocation9 + $0x84] ss:$16 sps:$4 sm:$0xff]   ;;  %v3666_v37 = vld [vmem:[#allocation9 + $0x8c] ss:$16 sps:$4 sm:$0xff]  }
 0x1b2   : > { %1596 = vmatprep.mubr.bf16.mxu0 %v1002_v43  ;;  %3354 = vmatprep.subr.bf16.mxu1 %v3608_v40  ;;  %v3661_v38 = vld [vmem:[#allocation9 + $0x80] ss:$16 sps:$4 sm:$0xff]   ;;  %v3664_v39 = vld [vmem:[#allocation9 + $0x88] ss:$16 sps:$4 sm:$0xff]  }
 0x1b3   : > { %3230 = vmatprep.subr.bf16.mxu0 %v3609_v42  ;;  %v3672_v42 = vld [vmem:[#allocation9 + $0xac] ss:$16 sps:$4 sm:$0xff]   ;;  %v3667_v43 = vld [vmem:[#allocation9 + $0xa0] ss:$16 sps:$4 sm:$0xff]  }
 0x1b4   : > { %3355 = vmatpush3.bf16.msra.mxu1 %v3608_v40  ;;  %v3669_v40 = vld [vmem:[#allocation9 + $0xa4] ss:$16 sps:$4 sm:$0xff]   ;;  %v3673_v47 = vld [vmem:[#allocation9 + $0xc0] ss:$16 sps:$4 sm:$0xff]  }
 0x1b5   : > { %3231 = vmatpush3.bf16.msra.mxu0 %v3610_v44  ;;  %3356 = vmatprep.subr.bf16.mxu1 %v3611_v45  ;;  %v3670_v44 = vld [vmem:[#allocation9 + $0xa8] ss:$16 sps:$4 sm:$0xff]  }
 0x1b6   : > { %3268 = vmatprep.subr.bf16.mxu0 %v3612_v46  ;;  %v3678_v46 = vld [vmem:[#allocation9 + $0xcc] ss:$16 sps:$4 sm:$0xff]  }
 0x1b8   : > { %3357 = vmatpush3.bf16.msra.mxu1 %v3611_v45  ;;  %1597 = vmatmul.mubr.bf16.vlgmr.msra.gmra.mrb[32].mxu0 %v1001_v48  ;;  %v3675_v45 = vld [vmem:[#allocation9 + $0xc4] ss:$16 sps:$4 sm:$0xff]  }
 0x1b9   : > { %1604 = vmatprep.mubr.bf16.mxu0 %v4227_v24  ;;  %3269 = vmatpush3.bf16.msra.mxu0 %v3613_v19  ;;  %v3676_v19 = vld [vmem:[#allocation9 + $0xc8] ss:$16 sps:$4 sm:$0xff]   ;;  %v3681_v48 = vld [vmem:[#allocation9 + $0xe4] ss:$16 sps:$4 sm:$0xff]  }
 0x1ba   : > { %3358 = vmatprep.subr.bf16.mxu1 %v3614_v49  ;;  %3270 = vmatprep.subr.bf16.mxu0 %v3615_v50  ;;  %v3679_v50 = vld [vmem:[#allocation9 + $0xe0] ss:$16 sps:$4 sm:$0xff]  }
 0x1bc   : > { %3359 = vmatpush3.bf16.msra.mxu1 %v3614_v49  ;;  %v3684_v49 = vld [vmem:[#allocation9 + $0xec] ss:$16 sps:$4 sm:$0xff]  }
 0x1bd   : > { %3271 = vmatpush3.bf16.msra.mxu0 %v3616_v52  ;;  %3368 = vmatprep.subr.bf16.mxu1 %v3617_v51  ;;  %v3682_v52 = vld [vmem:[#allocation9 + $0xe8] ss:$16 sps:$4 sm:$0xff]  }
 0x1be   : > { %3272 = vmatprep.subr.bf16.mxu0 %v3618_v53 }
 0x1bf   : > { %3361 = vmatmul.mubr.bf16.vlgmr.msra.gmra.mrb[16].mxu1 %v1006_v54 }
 0x1c0   : > { %3364 = vmatprep.mubr.bf16.mxu1 %v1009_v56  ;;  %3369 = vmatpush3.bf16.msra.mxu1 %v3617_v51  ;;  %v3900_v51 = vmov 0  }
 0x1c1   : > { %1605 = vmatmul.mubr.bf16.gmra.mrb[36].mxu0 %v1004_v62  ;;  %3370 = vmatprep.subr.bf16.mxu1 %v3620_v22 }
 0x1c2   : > { %1612 = vmatprep.mubr.bf16.mxu0 %v4245_v60  ;;  %3273 = vmatpush3.bf16.msra.mxu0 %v3619_v61 }
 0x1c3   : > { %3274 = vmatprep.subr.bf16.mxu0 %v3621_v63 }
 0x1c4   : > { %3371 = vmatpush3.bf16.msra.mxu1 %v3620_v22 }
 0x1c5   : > { %3372 = vmatprep.subr.bf16.mxu1 %v3623_v0 }
 0x1c6   : > { %3275 = vmatpush3.bf16.msra.mxu0 %v3622_v21 }
 0x1c7   : > { %3365 = vmatmul.mubr.bf16.gmra.mrb[20].mxu1 %v1012_v57  ;;  %3276 = vmatprep.subr.bf16.mxu0 %v3624_v55 }
 0x1c8   : > { %3373 = vmatpush3.bf16.msra.mxu1 %v3623_v0  ;;  %3384 = vmatprep.mubr.bf16.mxu1 %v1006_v54 }
 0x1c9   : > { %1613 = vmatmul.mubr.bf16.gmra.mrb[40].mxu0 %v1007_v58  ;;  %3374 = vmatprep.subr.bf16.mxu1 %v3626_v1 }
 0x1ca   : > { %1620 = vmatprep.mubr.bf16.mxu0 %v4260_v13  ;;  %3277 = vmatpush3.bf16.msra.mxu0 %v3625_v23 }
 0x1cb   : > { %3278 = vmatprep.subr.bf16.mxu0 %v3627_v2 }
 0x1cc   : > { %3375 = vmatpush3.bf16.msra.mxu1 %v3626_v1 }
 0x1cd   : > { %3376 = vmatprep.subr.bf16.mxu1 %v3629_v3 }
 0x1ce   : > { %3279 = vmatpush3.bf16.msra.mxu0 %v3628_v4 }
 0x1cf   : > { %3280 = vmatprep.subr.bf16.mxu0 %v3630_v5 }
 0x1d0   : > { %3377 = vmatpush3.bf16.msra.mxu1 %v3629_v3 }
 0x1d1   : > { %1621 = vmatmul.mubr.bf16.gmra.mrb[44].mxu0 %v1010_v59  ;;  %3378 = vmatprep.subr.bf16.mxu1 %v3632_v6 }
 0x1d2   : > { %3281 = vmatpush3.bf16.msra.mxu0 %v3631_v7  ;;  %1956 = vmatprep.mubr.bf16.mxu0 %v4227_v24  ;;  %v1730_v24 = vpack.c.bf16 %v1718_v36, %v4276_v32  ;;  %v3657_v32 = vld [vmem:[#allocation9 + $0x64] ss:$16 sps:$4 sm:$0xff]  }
 0x1d3   : > { %3282 = vmatprep.subr.bf16.mxu0 %v3633_v8 }
 0x1d4   : > { %3379 = vmatpush3.bf16.msra.mxu1 %v3632_v6 }
 0x1d5   : > { %3380 = vmatprep.subr.bf16.mxu1 %v3635_v9 }
 0x1d6   : > { %3283 = vmatpush3.bf16.msra.mxu0 %v3634_v10 }
 0x1d8   : > { %3381 = vmatpush3.bf16.msra.mxu1 %v3635_v9 }
 0x1d9   : > { %1957 = vmatmul.mubr.bf16.vlgmr.msra.gmra.mrb[48].mxu0 %v1004_v62  ;;  %3382 = vmatprep.subr.bf16.mxu1 %v3636_v12 }
 0x1da   : > { %1964 = vmatprep.mubr.bf16.mxu0 %v4245_v60  ;;  %v3639_v60 = vld [vmem:[#allocation9 + $0x4] ss:$16 sps:$4 sm:$0xff]  }
 0x1db   : > { %2296 = vmatprep.subr.bf16.mxu0 %v3639_v60 }
 0x1dc   : > { %3383 = vmatpush3.bf16.msra.mxu1 %v3636_v12  ;;  %2297 = vmatpush1.bf16.msra.mxu0 %v3637_v17 }
 0x1dd   : > { %2369 = vmatprep.subr.bf16.mxu1 %v3642_v16  ;;  %2298 = vmatprep.subr.bf16.mxu0 %v3645_v20 }
 0x1df   : > { %3385 = vmatmul.mubr.bf16.vlgmr.msra.gmra.mrb[16].mxu1 %v1009_v56 }
 0x1e0   : > { %3388 = vmatprep.mubr.bf16.mxu1 %v1012_v57  ;;  %2370 = vmatpush1.bf16.msra.mxu1 %v3640_v18 }
 0x1e1   : > { %1965 = vmatmul.mubr.bf16.gmra.mrb[52].mxu0 %v1007_v58  ;;  %2371 = vmatprep.subr.bf16.mxu1 %v3648_v25 }
 0x1e2   : > { %1972 = vmatprep.mubr.bf16.mxu0 %v4260_v13  ;;  %v3643_v13 = vld [vmem:[#allocation9 + $0x20] ss:$16 sps:$4 sm:$0xff]  }
 0x1e3   : > { %2299 = vmatpush1.bf16.msra.mxu0 %v3643_v13 }
 0x1e4   : > { %2372 = vmatpush1.bf16.msra.mxu1 %v3646_v27  ;;  %2300 = vmatprep.subr.bf16.mxu0 %v3651_v11 }
 0x1e5   : > { %2373 = vmatprep.subr.bf16.mxu1 %v3654_v28 }
 0x1e7   : > { %3389 = vmatmul.mubr.bf16.gmra.mrb[20].mxu1 %v1730_v24  ;;  %2301 = vmatpush1.bf16.msra.mxu0 %v3649_v29 }
 0x1e8   : > { %2374 = vmatpush1.bf16.msra.mxu1 %v3652_v30  ;;  %2302 = vmatprep.subr.bf16.mxu0 %v3657_v32 }
 0x1e9   : > { %1973 = vmatmul.mubr.bf16.gmra.mrb[56].mxu0 %v1010_v59  ;;  %2375 = vmatprep.subr.bf16.mxu1 %v3660_v33 }
 0x1ea   : > { %1980 = vmatprep.mubr.bf16.mxu0 %v1729_v14  ;;  %2401 = vmatprep.mubr.bf16.mxu1 %v3900_v51 }
 0x1eb   : > { %2303 = vmatpush1.bf16.msra.mxu0 %v3655_v31 }
 0x1ec   : > { %2376 = vmatpush1.bf16.msra.mxu1 %v3658_v34  ;;  %2304 = vmatprep.subr.bf16.mxu0 %v3663_v35 }
 0x1ed   : > { %2377 = vmatprep.subr.bf16.mxu1 %v3666_v37 }
 0x1ef   : > { %2305 = vmatpush1.bf16.msra.mxu0 %v3661_v38 }
 0x1f0   : > { %2378 = vmatpush1.bf16.msra.mxu1 %v3664_v39  ;;  %2306 = vmatprep.subr.bf16.mxu0 %v3669_v40 }
 0x1f1   : > { %1981 = vmatmul.mubr.bf16.gmra.mrb[60].mxu0 %v1728_v15  ;;  %2379 = vmatprep.subr.bf16.mxu1 %v3672_v42 }
 0x1f2   : > { %2328 = vmatprep.mubr.bf16.mxu0 %v3900_v51 }
 0x1f3   : > { %2307 = vmatpush1.bf16.msra.mxu0 %v3667_v43 }
 0x1f4   : > { %2380 = vmatpush1.bf16.msra.mxu1 %v3670_v44  ;;  %2308 = vmatprep.subr.bf16.mxu0 %v3675_v45 }
 0x1f5   : > { %2381 = vmatprep.subr.bf16.mxu1 %v3678_v46 }
 0x1f7   : > { %2309 = vmatpush1.bf16.msra.mxu0 %v3673_v47 }
 0x1f8   : > { %2382 = vmatpush1.bf16.msra.mxu1 %v3676_v19  ;;  %2310 = vmatprep.subr.bf16.mxu0 %v3681_v48 }
 0x1f9   : > { %2383 = vmatprep.subr.bf16.mxu1 %v3684_v49 }
 0x1fb   : > { %2311 = vmatpush1.bf16.msra.mxu0 %v3679_v50 }
 0x1fc   : > { %2384 = vmatpush1.bf16.msra.mxu1 %v3682_v52 }
 0x26b   : > { %v3180_v53 = vpop.f32.mrb[16].mxu0 }
 0x26c   : > { %v3181_v54 = vpop.f32.mrb[17].mxu0 }
 0x26d   : > { %v3182_v22 = vadd.f32 %v3181_v54, %v3180_v53  ;;  %v3183_v56 = vpop.f32.mrb[18].mxu0 }
 0x26e   : > { %v3184_v61 = vpop.f32.mrb[19].mxu0 }
 0x26f   : > { %v3185_v62 = vadd.f32 %v3184_v61, %v3183_v56  ;;  %v4319_v56 = vld [vmem:[%s4657_s6] ss:$0 sm:$0xff] }
 0x273   : > { %v3186_v63 = vpop.f32.mrb[20].mxu0 }
 0x274   : > { %v3187_v0 = vpop.f32.mrb[21].mxu0 }
 0x275   : > { %v3188_v21 = vadd.f32 %v3187_v0, %v3186_v63  ;;  %v3189_v55 = vpop.f32.mrb[22].mxu0  ;;  %v4324_v0 = vld [vmem:[%s4658_s7] ss:$0 sm:$0xff] }
 0x276   : > { %v3190_v57 = vpop.f32.mrb[23].mxu0 }
 0x277   : > { %v3191_v1 = vadd.f32 %v3190_v57, %v3189_v55 }
 0x27b   : > { %v3192_v23 = vpop.f32.mrb[24].mxu0 }
 0x27c   : > { %v3193_v58 = vpop.f32.mrb[25].mxu0 }
 0x27d   : > { %v3194_v2 = vadd.f32 %v3193_v58, %v3192_v23  ;;  %v3195_v3 = vpop.f32.mrb[26].mxu0 }
 0x27e   : > { %v3196_v4 = vpop.f32.mrb[27].mxu0 }
 0x27f   : > { %v3197_v5 = vadd.f32 %v3196_v4, %v3195_v3 }
 0x283   : > { %v3198_v6 = vpop.f32.mrb[28].mxu0 }
 0x284   : > { %v3199_v7 = vpop.f32.mrb[29].mxu0 }
 0x285   : > { %v3200_v59 = vadd.f32 %v3199_v7, %v3198_v6  ;;  %v3201_v8 = vpop.f32.mrb[30].mxu0 }
 0x286   : > { %v3202_v9 = vpop.f32.mrb[31].mxu0 }
 0x287   : > { %v3203_v10 = vadd.f32 %v3202_v9, %v3201_v8 }
 0x28b   : > { %v3232_v12 = vpop.f32.mrb[32].mxu0 }
 0x28c   : > { %v3233_v36 = vpop.f32.mrb[33].mxu0 }
 0x28d   : > { %v3234_v24 = vadd.f32 %v3233_v36, %v3232_v12  ;;  %v3235_v26 = vpop.f32.mrb[34].mxu0 }
 0x28e   : > { %v3236_v14 = vpop.f32.mrb[35].mxu0 }
 0x28f   : > { %v3395_v41 = vadd.f32 %v3234_v24, %v3182_v22  ;;  %v3237_v15 = vadd.f32 %v3236_v14, %v3235_v26 }
 0x291   : > { %v3401_v60 = vadd.f32 %v3237_v15, %v3185_v62 }
 0x294   : > { %v3238_v16 = vpop.f32.mrb[36].mxu0 }
 0x295   : > { %v3239_v17 = vpop.f32.mrb[37].mxu0 }
 0x296   : > { %v3240_v18 = vadd.f32 %v3239_v17, %v3238_v16  ;;  %v3241_v13 = vpop.f32.mrb[38].mxu0 }
 0x297   : > { %v3242_v20 = vpop.f32.mrb[39].mxu0 }
 0x298   : > { %v3392_v25 = vadd.f32 %v3240_v18, %v3188_v21  ;;  %v3243_v27 = vadd.f32 %v3242_v20, %v3241_v13 }
 0x29a   : > { %v3398_v11 = vadd.f32 %v3243_v27, %v3191_v1 }
 0x29c   : > { %v3244_v28 = vpop.f32.mrb[40].mxu0 }
 0x29d   : > { %v3245_v29 = vpop.f32.mrb[41].mxu0 }
 0x29e   : > { %v3246_v30 = vadd.f32 %v3245_v29, %v3244_v28  ;;  %v3247_v31 = vpop.f32.mrb[42].mxu0 }
 0x29f   : > { %v3248_v32 = vpop.f32.mrb[43].mxu0 }
 0x2a0   : > { %v3407_v33 = vadd.f32 %v3246_v30, %v3194_v2  ;;  %v3249_v34 = vadd.f32 %v3248_v32, %v3247_v31 }
 0x2a2   : > { %v3413_v35 = vadd.f32 %v3249_v34, %v3197_v5 }
 0x2a4   : > { %v3250_v37 = vpop.f32.mrb[44].mxu0 }
 0x2a5   : > { %v3251_v38 = vpop.f32.mrb[45].mxu0 }
 0x2a6   : > { %v3252_v39 = vadd.f32 %v3251_v38, %v3250_v37  ;;  %v3253_v40 = vpop.f32.mrb[46].mxu0 }
 0x2a7   : > { %v3254_v42 = vpop.f32.mrb[47].mxu0 }
 0x2a8   : > { %v4312_v43 = vadd.f32 %v3252_v39, %v3200_v59  ;;  %v3255_v44 = vadd.f32 %v3254_v42, %v3253_v40 }
 0x2aa   : > { %v4314_v45 = vadd.f32 %v3255_v44, %v3203_v10 }
 0x2ac   : > { %v3284_v46 = vpop.f32.mrb[48].mxu0 }
 0x2ad   : > { %v3285_v47 = vpop.f32.mrb[49].mxu0 }
 0x2ae   : > { %v3286_v19 = vadd.f32 %v3285_v47, %v3284_v46  ;;  %v3287_v48 = vpop.f32.mrb[50].mxu0 }
 0x2af   : > { %v3288_v49 = vpop.f32.mrb[51].mxu0 }
 0x2b0   : > { %v3289_v50 = vadd.f32 %v3288_v49, %v3287_v48  ;;  %v3396_v52 = vadd.f32 %v3395_v41, %v3286_v19 }
 0x2b2   : > { %v3386_v53 = vpop.f32.mrb[16].mxu1  ;;  %v3402_v54 = vadd.f32 %v3401_v60, %v3289_v50 }
 0x2b3   : > { %v2023_v22 = vpop.f32.mrb[17].mxu1 }
 0x2b4   : > { %v3397_v61 = vadd.f32 %v3396_v52, %v2023_v22  ;;  %v3290_v62 = vpop.f32.mrb[52].mxu0  ;;  %v3387_v63 = vpop.f32.mrb[18].mxu1 }
 0x2b5   : > { %v3291_v21 = vpop.f32.mrb[53].mxu0  ;;  %v2026_v55 = vpop.f32.mrb[19].mxu1 }
 0x2b6   : > { %v2069_v57 = vmul.f32 %v3397_v61, %v4319_v56  ;;  %v3292_v1 = vadd.f32 %v3291_v21, %v3290_v62  ;;  %v3403_v23 = vadd.f32 %v3402_v54, %v2026_v55  ;;  %v3293_v58 = vpop.f32.mrb[54].mxu0 }
 0x2b7   : > { %v3294_v2 = vpop.f32.mrb[55].mxu0 }
 0x2b8   : > { %v2084_v3 = vadd.f32 %v4324_v0, %v2069_v57  ;;  %v3393_v4 = vadd.f32 %v3392_v25, %v3292_v1  ;;  %v2070_v5 = vmul.f32 %v3403_v23, %v4319_v56  ;;  %v3295_v6 = vadd.f32 %v3294_v2, %v3293_v58 }
 0x2b9   : > { %v2444_v57 = vlaneseq }
 0x2ba   : > { %v3394_v7 = vadd.f32 %v3393_v4, %v3386_v53  ;;  %v2085_v59 = vadd.f32 %v4324_v0, %v2070_v5  ;;  %v3399_v8 = vadd.f32 %v3398_v11, %v3295_v6  ;;  %v3390_v9 = vpop.f32.mrb[20].mxu1  ;;  %v2092_v12 = vmax.f32 %v2084_v3, 0.0 }
 0x2bb   : > { %v2039_v10 = vpop.f32.mrb[21].mxu1  ;;  %v2445_v1 = vshrl.u32 %v2444_v57, 7  ;;  %v4445_v57 = vld [vmem:[%s4164_s11 + $0x70] sm:$0xff] }
 0x2bc   : > { %v2071_v36 = vmul.f32 %v3394_v7, %v4319_v56  ;;  %v2093_v24 = vmax.f32 %v2085_v59, 0.0  ;;  %v3400_v26 = vadd.f32 %v3399_v8, %v3387_v63  ;;  %v3296_v14 = vpop.f32.mrb[56].mxu0  ;;  %v3391_v41 = vpop.f32.mrb[22].mxu1  ;;  %v4367_v59 = vld [vmem:[%s4164_s11] sm:$0xff] }
 0x2bd   : > { %v3297_v15 = vpop.f32.mrb[57].mxu0  ;;  %v2042_v60 = vpop.f32.mrb[23].mxu1  ;;  %v2454_v23 = vsub.s32 2, %v2445_v1  ;;  %v2450_v58 = vsub.s32 1, %v2445_v1  ;;  %v2458_v2 = vsub.s32 3, %v2445_v1  ;;  %v2550_v8 = vunpack.c.l.bf16 %v4367_v59 }
 0x2be   : > { %v2100_v16 = vpack.c.bf16 %v2093_v24, %v2092_v12  ;;  %v2072_v17 = vmul.f32 %v3400_v26, %v4319_v56  ;;  %v3298_v18 = vadd.f32 %v3297_v15, %v3296_v14  ;;  %v3299_v13 = vpop.f32.mrb[58].mxu0  ;;  %v2086_v20 = vadd.f32 %v4324_v0, %v2071_v36  ;;  %v4375_v12 = vld [vmem:[%s4164_s11 + $0x8] sm:$0xff] }
 0x2bf   : > { %v3300_v25 = vpop.f32.mrb[59].mxu0  ;;  %v2552_v36 = vunpack.c.l.bf16 %v4375_v12  ;;  %v2551_v24 = vunpack.c.h.bf16 %v4367_v59  ;;  %v2553_v14 = vunpack.c.h.bf16 %v4375_v12 }
 0x2c0   : > { %v3408_v27 = vadd.f32 %v3407_v33, %v3298_v18  ;;  %v3301_v11 = vadd.f32 %v3300_v25, %v3299_v13  ;;  %2329 = vmatmul.mubr.bf16.vlgmr.msra.gmra.mrb[64].mxu0 %v2100_v16  ;;  %2402 = vmatmul.mubr.bf16.vlgmr.msra.gmra.mrb[24].mxu1 %v2100_v16  ;;  %v2087_v28 = vadd.f32 %v4324_v0, %v2072_v17  ;;  %v2094_v31 = vmax.f32 %v2086_v20, 0.0  ;;  %v4393_v13 = vld [vmem:[%s4164_s11 + $0x20] sm:$0xff]  ;;  %v4397_v25 = vld [vmem:[%s4164_s11 + $0x28] sm:$0xff] }
 0x2c1   : > { %2338 = vmatprep.mubr.bf16.mxu0 %v3900_v51  ;;  %2411 = vmatprep.mubr.bf16.mxu1 %v3900_v51  ;;  %v2558_v20 = vunpack.c.l.bf16 %v4393_v13 }
 0x2c2   : > { %v3409_v29 = vadd.f32 %v3408_v27, %v2039_v10  ;;  %v3414_v30 = vadd.f32 %v3413_v35, %v3301_v11  ;;  %v2095_v32 = vmax.f32 %v2087_v28, 0.0  ;;  %v2560_v27 = vunpack.c.l.bf16 %v4397_v25 }
 0x2c3   : > { %v2559_v11 = vunpack.c.h.bf16 %v4393_v13  ;;  %v2561_v28 = vunpack.c.h.bf16 %v4397_v25 }
 0x2c4   : > { %v2073_v34 = vmul.f32 %v3409_v29, %v4319_v56  ;;  %v3415_v37 = vadd.f32 %v3414_v30, %v2042_v60  ;;  %v3302_v38 = vpop.f32.mrb[60].mxu0  ;;  %v2101_v39 = vpack.c.bf16 %v2095_v32, %v2094_v31  ;;  %v4387_v60 = vld [vmem:[%s4164_s11 + $0x18] sm:$0xff]  ;;  %v4403_v29 = vld [vmem:[%s4164_s11 + $0x30] sm:$0xff] }
 0x2c5   : > { %v3303_v40 = vpop.f32.mrb[61].mxu0  ;;  %v2556_v16 = vunpack.c.l.bf16 %v4387_v60  ;;  %v2557_v18 = vunpack.c.h.bf16 %v4387_v60  ;;  %v2562_v30 = vunpack.c.l.bf16 %v4403_v29  ;;  %v4407_v31 = vld [vmem:[%s4164_s11 + $0x38] sm:$0xff] }
 0x2c6   : > { %v2074_v33 = vmul.f32 %v3415_v37, %v4319_v56  ;;  %v3304_v42 = vadd.f32 %v3303_v40, %v3302_v38  ;;  %v3305_v44 = vpop.f32.mrb[62].mxu0  ;;  %v2088_v46 = vadd.f32 %v4324_v0, %v2073_v34  ;;  %v2564_v32 = vunpack.c.l.bf16 %v4407_v31  ;;  %v4413_v38 = vld [vmem:[%s4164_s11 + $0x40] sm:$0xff]  ;;  %v4417_v40 = vld [vmem:[%s4164_s11 + $0x48] sm:$0xff] }
 0x2c7   : > { %v3306_v47 = vpop.f32.mrb[63].mxu0  ;;  %v2563_v34 = vunpack.c.h.bf16 %v4403_v29  ;;  %v2565_v37 = vunpack.c.h.bf16 %v4407_v31 }
 0x2c8   : > { %v3405_v19 = vadd.f32 %v4312_v43, %v3304_v42  ;;  %v3307_v48 = vadd.f32 %v3306_v47, %v3305_v44  ;;  %2339 = vmatmul.mubr.bf16.gmra.mrb[68].mxu0 %v2101_v39  ;;  %2412 = vmatmul.mubr.bf16.gmra.mrb[28].mxu1 %v2101_v39  ;;  %v2089_v35 = vadd.f32 %v4324_v0, %v2074_v33  ;;  %v2096_v52 = vmax.f32 %v2088_v46, 0.0  ;;  %v4423_v46 = vld [vmem:[%s4164_s11 + $0x50] sm:$0xff] }
 0x2c9   : > { %2348 = vmatprep.mubr.bf16.mxu0 %v3900_v51  ;;  %2421 = vmatprep.mubr.bf16.mxu1 %v3900_v51  ;;  %v2566_v39 = vunpack.c.l.bf16 %v4413_v38  ;;  %v2568_v33 = vunpack.c.l.bf16 %v4417_v40  ;;  %v2567_v42 = vunpack.c.h.bf16 %v4413_v38  ;;  %v2569_v44 = vunpack.c.h.bf16 %v4417_v40 }
 0x2ca   : > { %v3406_v49 = vadd.f32 %v3405_v19, %v3390_v9  ;;  %v3411_v50 = vadd.f32 %v4314_v45, %v3307_v48  ;;  %v2097_v53 = vmax.f32 %v2089_v35, 0.0  ;;  %v2570_v47 = vunpack.c.l.bf16 %v4423_v46  ;;  %v4427_v19 = vld [vmem:[%s4164_s11 + $0x58] sm:$0xff] }
 0x2cb   : > { %v2572_v48 = vunpack.c.l.bf16 %v4427_v19 }
 0x2cc   : > { %v2075_v54 = vmul.f32 %v3406_v49, %v4319_v56  ;;  %v3412_v22 = vadd.f32 %v3411_v50, %v3391_v41  ;;  %v2102_v61 = vpack.c.bf16 %v2097_v53, %v2096_v52  ;;  %v4383_v41 = vld [vmem:[%s4164_s11 + $0x10] sm:$0xff]  ;;  %v4433_v53 = vld [vmem:[%s4164_s11 + $0x60] sm:$0xff] }
 0x2cd   : > { %v2554_v15 = vunpack.c.l.bf16 %v4383_v41  ;;  %v2555_v17 = vunpack.c.h.bf16 %v4383_v41 }
 0x2ce   : > { %v2076_v43 = vmul.f32 %v3412_v22, %v4319_v56  ;;  %v2090_v62 = vadd.f32 %v4324_v0, %v2075_v54  ;;  %v2446_v56 = vsub.s32 0, %v2445_v1  ;;  %v4437_v22 = vld [vmem:[%s4164_s11 + $0x68] sm:$0xff] }
 0x2d0   : > { %2349 = vmatmul.mubr.bf16.gmra.mrb[72].mxu0 %v2102_v61  ;;  %2422 = vmatmul.mubr.bf16.gmra.mrb[32].mxu1 %v2102_v61  ;;  %v2091_v63 = vadd.f32 %v4324_v0, %v2076_v43  ;;  %v2098_v21 = vmax.f32 %v2090_v62, 0.0  ;;  %v2442_v0 = vld [vmem:[%s4659_s8] sm:$0xf] }
 0x2d1   : > { %2358 = vmatprep.mubr.bf16.mxu0 %v3900_v51  ;;  %2431 = vmatprep.mubr.bf16.mxu1 %v3900_v51  ;;  %v2496_v51 = vld [vmem:[%s4686_s19] sm:$0xf]  ;;  %v4356_v3 = vrot.slane %v2442_v0, %v2446_v56  ;;  %v4358_v4 = vrot.slane %v2442_v0, %v2454_v23  ;;  %v4360_v5 = vrot.slane %v2442_v0, %v2450_v58 }
 0x2d2   : > { %v2099_v45 = vmax.f32 %v2091_v63, 0.0  ;;  %v4362_v6 = vrot.slane %v2442_v0, %v2458_v2  ;;  %v4364_v7 = vrot.slane %v2496_v51, %v2446_v56  ;;  %v4370_v9 = vrot.slane %v2496_v51, %v2454_v23  ;;  %v4449_v56 = vld [vmem:[%s4164_s11 + $0x78] sm:$0xff]  ;;  %s4492_s11 = scalar_lea.vmem [#allocation11], %s2884_s25  ;;  %s3083_s25 = sshll.u32 %s3980_s17, 11 }
 0x2d3   : > { %v4372_v10 = vrot.slane %v2496_v51, %v2450_v58  ;;  %v4379_v26 = vrot.slane %v2496_v51, %v2458_v2  ;;  %s2772_s21 = sshll.u32 %s4492_s11, 4  ;;  %s4603_s30 = scalar_lea.hbm %s4697_s29, %s3083_s25  ;;  %s4605_s21 = int_to_ptr.vmem [resolvable:$true] %s2772_s21 }
 0x2d4   : > { %v2103_v55 = vpack.c.bf16 %v2099_v45, %v2098_v21  ;;  %s2759_s17 = scalar_lea.sflag [#allocation5], %s4158_s13  ;;  %s3815_s10 = scalar_lea.vmem %s4605_s21, 2048 }
 0x2d5   : > { %p3816_p10 = scmp.ne.s32.totalorder %s4605_s21, %s3815_s10  ;;  %p3822_p12 = scmp.lt.s32.totalorder %s4605_s21, %s3820_s18 }
 0x2d6   : > { %p3823_p2 = scmp.lt.s32.totalorder %s3821_s28, %s3815_s10 }
 0x2d7   : > { %p3817_p3 = pnand %p3816_p10, %p4107_p5 }
 0x2d8   : > { %2359 = vmatmul.mubr.bf16.gmra.mrb[76].mxu0 %v2103_v55  ;;  %2432 = vmatmul.mubr.bf16.gmra.mrb[36].mxu1 %v2103_v55  ;;  %p3824_p1 = por %p3823_p2, %p3822_p12 }
 0x2d9   : > { %p3818_p7 = pneg %p3817_p3 }
 0x2db   : > { %p3825_p4 = pnand %p3824_p1, %p3818_p7 }
 0x393   : > { %v2330_v50 = vpop.f32.mrb[64].mxu0  ;;  %v2403_v52 = vpop.f32.mrb[24].mxu1 }
 0x394   : > { %v2464_v63 = vmul.f32 %v4356_v3, %v2330_v50  ;;  %v2466_v21 = vmul.f32 %v4358_v4, %v2403_v52  ;;  %v2332_v45 = vpop.f32.mrb[65].mxu0  ;;  %v2405_v55 = vpop.f32.mrb[25].mxu1 }
 0x395   : > { %v2465_v58 = vmul.f32 %v4360_v5, %v2332_v45  ;;  %v2467_v2 = vmul.f32 %v4362_v6, %v2405_v55  ;;  %v2334_v0 = vpop.f32.mrb[66].mxu0  ;;  %v2407_v51 = vpop.f32.mrb[26].mxu1 }
 0x396   : > { %v2518_v62 = vadd.f32 %v4364_v7, %v2464_v63  ;;  %v2520_v43 = vadd.f32 %v4370_v9, %v2466_v21  ;;  %v2468_v1 = vmul.f32 %v4356_v3, %v2334_v0  ;;  %v2470_v61 = vmul.f32 %v4358_v4, %v2407_v51  ;;  %v2336_v54 = vpop.f32.mrb[67].mxu0  ;;  %v2409_v23 = vpop.f32.mrb[27].mxu1 }
 0x397   : > { %v2519_v45 = vadd.f32 %v4372_v10, %v2465_v58  ;;  %v2521_v55 = vadd.f32 %v4379_v26, %v2467_v2  ;;  %v2469_v49 = vmul.f32 %v4360_v5, %v2336_v54  ;;  %v2471_v50 = vmul.f32 %v4362_v6, %v2409_v23 }
 0x398   : > { %v2582_v52 = vadd.f32 %v2550_v8, %v2518_v62  ;;  %v2584_v63 = vadd.f32 %v2552_v36, %v2520_v43  ;;  %v2522_v21 = vadd.f32 %v4364_v7, %v2468_v1  ;;  %v2524_v0 = vadd.f32 %v4370_v9, %v2470_v61 }
 0x399   : > { %v2583_v51 = vadd.f32 %v2551_v24, %v2519_v45  ;;  %v2585_v58 = vadd.f32 %v2553_v14, %v2521_v55  ;;  %v2523_v54 = vadd.f32 %v4372_v10, %v2469_v49  ;;  %v2525_v23 = vadd.f32 %v4379_v26, %v2471_v50 }
 0x39a   : > { %v2614_v2 = vmax.f32 %v2582_v52, 0.0  ;;  %v2616_v35 = vmax.f32 %v2584_v63, 0.0  ;;  %v2586_v8 = vadd.f32 %v2554_v15, %v2522_v21  ;;  %v2588_v36 = vadd.f32 %v2556_v16, %v2524_v0 }
 0x39b   : > { %v2615_v43 = vmax.f32 %v2583_v51, 0.0  ;;  %v2617_v61 = vmax.f32 %v2585_v58, 0.0  ;;  %v2587_v59 = vadd.f32 %v2555_v17, %v2523_v54  ;;  %v2589_v12 = vadd.f32 %v2557_v18, %v2525_v23  ;;  %v2340_v24 = vpop.f32.mrb[68].mxu0  ;;  %v2413_v14 = vpop.f32.mrb[28].mxu1 }
 0x39c   : > { %v2618_v49 = vmax.f32 %v2586_v8, 0.0  ;;  %v2620_v62 = vmax.f32 %v2588_v36, 0.0  ;;  %v2472_v1 = vmul.f32 %v4356_v3, %v2340_v24  ;;  %v2474_v15 = vmul.f32 %v4358_v4, %v2413_v14  ;;  %v2342_v50 = vpop.f32.mrb[69].mxu0  ;;  %v2415_v52 = vpop.f32.mrb[29].mxu1 }
 0x39d   : > { %v3067_v16 = vpack.c.bf16 %v2615_v43, %v2614_v2  ;;  %v3068_v45 = vpack.c.bf16 %v2617_v61, %v2616_v35  ;;  %v2619_v55 = vmax.f32 %v2587_v59, 0.0  ;;  %v2621_v63 = vmax.f32 %v2589_v12, 0.0  ;;  %v2344_v41 = vpop.f32.mrb[70].mxu0  ;;  %v2417_v17 = vpop.f32.mrb[30].mxu1 }
 0x39e   : > { %v2526_v60 = vadd.f32 %v4364_v7, %v2472_v1  ;;  %v2528_v18 = vadd.f32 %v4370_v9, %v2474_v15  ;;  %v2473_v21 = vmul.f32 %v4360_v5, %v2342_v50  ;;  %v2475_v0 = vmul.f32 %v4362_v6, %v2415_v52  ;;  %v2346_v51 = vpop.f32.mrb[71].mxu0  ;;  %v2419_v58 = vpop.f32.mrb[31].mxu1 }
 0x39f   : > { %2742 = vst [vmem:[%s4492_s11] sm:$0xff] %v3067_v16  ;;  %2743 = vst [vmem:[%s4492_s11 + $0x8] sm:$0xff] %v3068_v45  ;;  %v3069_v35 = vpack.c.bf16 %v2619_v55, %v2618_v49  ;;  %v3070_v54 = vpack.c.bf16 %v2621_v63, %v2620_v62  ;;  %v2476_v23 = vmul.f32 %v4356_v3, %v2344_v41 }
 0x3a0   : > { %v2478_v2 = vmul.f32 %v4358_v4, %v2417_v17  ;;  %v2590_v8 = vadd.f32 %v2558_v20, %v2526_v60  ;;  %v2592_v36 = vadd.f32 %v2560_v27, %v2528_v18  ;;  %v2527_v43 = vadd.f32 %v4372_v10, %v2473_v21 }
 0x3a1   : > { %v2529_v61 = vadd.f32 %v4379_v26, %v2475_v0  ;;  %2744 = vst [vmem:[%s4492_s11 + $0x10] sm:$0xff] %v3069_v35  ;;  %2745 = vst [vmem:[%s4492_s11 + $0x18] sm:$0xff] %v3070_v54  ;;  %v2530_v59 = vadd.f32 %v4364_v7, %v2476_v23  ;;  %v2477_v24 = vmul.f32 %v4360_v5, %v2346_v51 }
 0x3a2   : > { %v2532_v12 = vadd.f32 %v4370_v9, %v2478_v2  ;;  %v2479_v14 = vmul.f32 %v4362_v6, %v2419_v58  ;;  %v2622_v49 = vmax.f32 %v2590_v8, 0.0  ;;  %v2624_v62 = vmax.f32 %v2592_v36, 0.0 }
 0x3a3   : > { %v2591_v20 = vadd.f32 %v2559_v11, %v2527_v43  ;;  %v2593_v27 = vadd.f32 %v2561_v28, %v2529_v61  ;;  %v2594_v1 = vadd.f32 %v2562_v30, %v2530_v59  ;;  %v2531_v50 = vadd.f32 %v4372_v10, %v2477_v24  ;;  %v2350_v16 = vpop.f32.mrb[72].mxu0  ;;  %v2423_v45 = vpop.f32.mrb[32].mxu1 }
 0x3a4   : > { %v2596_v15 = vadd.f32 %v2564_v32, %v2532_v12  ;;  %v2533_v52 = vadd.f32 %v4379_v26, %v2479_v14  ;;  %v2480_v13 = vmul.f32 %v4356_v3, %v2350_v16  ;;  %v2482_v11 = vmul.f32 %v4358_v4, %v2423_v45  ;;  %v2352_v25 = vpop.f32.mrb[73].mxu0  ;;  %v2425_v28 = vpop.f32.mrb[33].mxu1 }
 0x3a5   : > { %v2623_v55 = vmax.f32 %v2591_v20, 0.0  ;;  %v2625_v63 = vmax.f32 %v2593_v27, 0.0  ;;  %v2626_v41 = vmax.f32 %v2594_v1, 0.0  ;;  %v2595_v32 = vadd.f32 %v2563_v34, %v2531_v50  ;;  %v2354_v60 = vpop.f32.mrb[74].mxu0  ;;  %v2427_v18 = vpop.f32.mrb[34].mxu1 }
 0x3a6   : > { %v2628_v30 = vmax.f32 %v2596_v15, 0.0  ;;  %v2597_v17 = vadd.f32 %v2565_v37, %v2533_v52  ;;  %v2534_v51 = vadd.f32 %v4364_v7, %v2480_v13  ;;  %v2536_v58 = vadd.f32 %v4370_v9, %v2482_v11  ;;  %v2356_v35 = vpop.f32.mrb[75].mxu0  ;;  %v2429_v54 = vpop.f32.mrb[35].mxu1 }
 0x3a7   : > { %v3071_v21 = vpack.c.bf16 %v2623_v55, %v2622_v49  ;;  %v3072_v0 = vpack.c.bf16 %v2625_v63, %v2624_v62  ;;  %v2627_v23 = vmax.f32 %v2595_v32, 0.0  ;;  %v2481_v8 = vmul.f32 %v4360_v5, %v2352_v25 }
 0x3a8   : > { %v2629_v2 = vmax.f32 %v2597_v17, 0.0  ;;  %v2483_v29 = vmul.f32 %v4362_v6, %v2425_v28  ;;  %v2598_v31 = vadd.f32 %v2566_v39, %v2534_v51  ;;  %v2600_v34 = vadd.f32 %v2568_v33, %v2536_v58 }
 0x3a9   : > { %2746 = vst [vmem:[%s4492_s11 + $0x20] sm:$0xff] %v3071_v21  ;;  %2747 = vst [vmem:[%s4492_s11 + $0x28] sm:$0xff] %v3072_v0  ;;  %v2484_v37 = vmul.f32 %v4356_v3, %v2354_v60  ;;  %v2486_v36 = vmul.f32 %v4358_v4, %v2427_v18  ;;  %v3073_v43 = vpack.c.bf16 %v2627_v23, %v2626_v41  ;;  %v4687_v60 = vunpack.c.h.bf16 %v4423_v46 }
 0x3aa   : > { %v3074_v61 = vpack.c.bf16 %v2629_v2, %v2628_v30  ;;  %v2535_v59 = vadd.f32 %v4372_v10, %v2481_v8  ;;  %v2537_v12 = vadd.f32 %v4379_v26, %v2483_v29  ;;  %v2630_v24 = vmax.f32 %v2598_v31, 0.0 }
 0x3ab   : > { %v2632_v14 = vmax.f32 %v2600_v34, 0.0  ;;  %v2538_v49 = vadd.f32 %v4364_v7, %v2484_v37  ;;  %v2540_v62 = vadd.f32 %v4370_v9, %v2486_v36  ;;  %2748 = vst [vmem:[%s4492_s11 + $0x30] sm:$0xff] %v3073_v43  ;;  %v2485_v20 = vmul.f32 %v4360_v5, %v2356_v35  ;;  %v2360_v1 = vpop.f32.mrb[76].mxu0  ;;  %v2433_v15 = vpop.f32.mrb[36].mxu1 }
 0x3ac   : > { %2749 = vst [vmem:[%s4492_s11 + $0x38] sm:$0xff] %v3074_v61  ;;  %v2599_v39 = vadd.f32 %v2567_v42, %v2535_v59  ;;  %v2601_v33 = vadd.f32 %v2569_v44, %v2537_v12  ;;  %v2487_v27 = vmul.f32 %v4362_v6, %v2429_v54  ;;  %v2488_v16 = vmul.f32 %v4356_v3, %v2360_v1  ;;  %v2362_v42 = vpop.f32.mrb[77].mxu0  ;;  %v2435_v45 = vpop.f32.mrb[37].mxu1 }
 0x3ad   : > { %v2602_v50 = vadd.f32 %v2570_v47, %v2538_v49  ;;  %v2604_v52 = vadd.f32 %v2572_v48, %v2540_v62  ;;  %v2490_v38 = vmul.f32 %v4358_v4, %v2433_v15  ;;  %v2539_v55 = vadd.f32 %v4372_v10, %v2485_v20  ;;  %v2364_v13 = vpop.f32.mrb[78].mxu0  ;;  %v2437_v11 = vpop.f32.mrb[38].mxu1 }
 0x3ae   : > { %v2631_v40 = vmax.f32 %v2599_v39, 0.0  ;;  %v2633_v44 = vmax.f32 %v2601_v33, 0.0  ;;  %v2541_v63 = vadd.f32 %v4379_v26, %v2487_v27  ;;  %v2542_v48 = vadd.f32 %v4364_v7, %v2488_v16  ;;  %v2366_v41 = vpop.f32.mrb[79].mxu0  ;;  %v2439_v30 = vpop.f32.mrb[39].mxu1 }
 0x3af   : > { %v2634_v47 = vmax.f32 %v2602_v50, 0.0  ;;  %v2636_v25 = vmax.f32 %v2604_v52, 0.0  ;;  %v2544_v28 = vadd.f32 %v4370_v9, %v2490_v38  ;;  %v2603_v18 = vadd.f32 %v4687_v60, %v2539_v55 }
 0x3b0   : > { %v3075_v32 = vpack.c.bf16 %v2631_v40, %v2630_v24  ;;  %v3076_v17 = vpack.c.bf16 %v2633_v44, %v2632_v14  ;;  %v4688_v21 = vunpack.c.h.bf16 %v4427_v19  ;;  %v4689_v51 = vunpack.c.l.bf16 %v4433_v53 }
 0x3b1   : > { %v4690_v35 = vunpack.c.l.bf16 %v4437_v22  ;;  %v2489_v23 = vmul.f32 %v4360_v5, %v2362_v42  ;;  %v2491_v2 = vmul.f32 %v4362_v6, %v2435_v45  ;;  %v2635_v8 = vmax.f32 %v2603_v18, 0.0 }
 0x3b2   : > { %v2605_v0 = vadd.f32 %v4688_v21, %v2541_v63  ;;  %v2606_v58 = vadd.f32 %v4689_v51, %v2542_v48  ;;  %2750 = vst [vmem:[%s4492_s11 + $0x40] sm:$0xff] %v3075_v32  ;;  %2751 = vst [vmem:[%s4492_s11 + $0x48] sm:$0xff] %v3076_v17  ;;  %v2492_v46 = vmul.f32 %v4356_v3, %v2364_v13  ;;  %v4691_v24 = vunpack.c.h.bf16 %v4433_v53 }
 0x3b3   : > { %v2608_v54 = vadd.f32 %v4690_v35, %v2544_v28  ;;  %v2494_v19 = vmul.f32 %v4358_v4, %v2437_v11  ;;  %v2543_v37 = vadd.f32 %v4372_v10, %v2489_v23  ;;  %v2545_v36 = vadd.f32 %v4379_v26, %v2491_v2 }
 0x3b4   : > { %v2637_v29 = vmax.f32 %v2605_v0, 0.0  ;;  %v2638_v31 = vmax.f32 %v2606_v58, 0.0  ;;  %v3077_v43 = vpack.c.bf16 %v2635_v8, %v2634_v47  ;;  %v2546_v59 = vadd.f32 %v4364_v7, %v2492_v46 }
 0x3b5   : > { %v2640_v34 = vmax.f32 %v2608_v54, 0.0  ;;  %v2548_v12 = vadd.f32 %v4370_v9, %v2494_v19  ;;  %v2607_v14 = vadd.f32 %v4691_v24, %v2543_v37  ;;  %v4692_v49 = vunpack.c.h.bf16 %v4437_v22 }
 0x3b6   : > { %v3078_v61 = vpack.c.bf16 %v2637_v29, %v2636_v25  ;;  %v2493_v4 = vmul.f32 %v4360_v5, %v2366_v41  ;;  %v2495_v62 = vmul.f32 %v4362_v6, %v2439_v30  ;;  %2752 = vst [vmem:[%s4492_s11 + $0x50] sm:$0xff] %v3077_v43  ;;  %v4693_v39 = vunpack.c.l.bf16 %v4445_v57 }
 0x3b7   : > { %v2609_v3 = vadd.f32 %v4692_v49, %v2545_v36  ;;  %v4694_v9 = vunpack.c.l.bf16 %v4449_v56  ;;  %v2639_v33 = vmax.f32 %v2607_v14, 0.0  ;;  %v4695_v50 = vunpack.c.h.bf16 %v4445_v57 }
 0x3b8   : > { %2753 = vst [vmem:[%s4492_s11 + $0x58] sm:$0xff] %v3078_v61  ;;  %v2610_v7 = vadd.f32 %v4693_v39, %v2546_v59  ;;  %v2547_v22 = vadd.f32 %v4372_v10, %v2493_v4  ;;  %v2549_v5 = vadd.f32 %v4379_v26, %v2495_v62  ;;  %v4696_v16 = vunpack.c.h.bf16 %v4449_v56 }
 0x3b9   : > { %v2612_v53 = vadd.f32 %v4694_v9, %v2548_v12  ;;  %v2641_v20 = vmax.f32 %v2609_v3, 0.0  ;;  %v3079_v1 = vpack.c.bf16 %v2639_v33, %v2638_v31 }
 0x3ba   : > { %v2642_v27 = vmax.f32 %v2610_v7, 0.0  ;;  %v2611_v52 = vadd.f32 %v4695_v50, %v2547_v22  ;;  %v2613_v38 = vadd.f32 %v4696_v16, %v2549_v5 }
 0x3bb   : > { %v2644_v6 = vmax.f32 %v2612_v53, 0.0  ;;  %v3080_v15 = vpack.c.bf16 %v2641_v20, %v2640_v34  ;;  %2754 = vst [vmem:[%s4492_s11 + $0x60] sm:$0xff] %v3079_v1 }
 0x3bc   : > { %v2643_v10 = vmax.f32 %v2611_v52, 0.0  ;;  %v2645_v26 = vmax.f32 %v2613_v38, 0.0 }
 0x3bd   : > { %2755 = vst [vmem:[%s4492_s11 + $0x68] sm:$0xff] %v3080_v15 }
 0x3be   : > { %v3081_v57 = vpack.c.bf16 %v2643_v10, %v2642_v27  ;;  %v3082_v56 = vpack.c.bf16 %v2645_v26, %v2644_v6 }
 0x3c0   : > { %2756 = vst [vmem:[%s4492_s11 + $0x70] sm:$0xff] %v3081_v57  ;;  %2757 = vst [vmem:[%s4492_s11 + $0x78] sm:$0xff] %v3082_v56 }
 0x3c1   : > { %3828 = shalt.err (!%p3825_p4)
}
 0x3c2   : > { %s3829_s27 = scalar_lea.hbm %s4603_s30, 2048  ;;  %s3833_s11 = scalar_lea.hbm %s4697_s29, 4096 }
 0x3c3   : > { %p3830_p9 = scmp.ne.s32.totalorder %s4603_s30, %s3829_s27  ;;  %p3834_p8 = scmp.lt.u32.totalorder %s4603_s30, %s4697_s29 }
 0x3c4   : > { %p3835_p13 = scmp.lt.u32.totalorder %s3833_s11, %s3829_s27  ;;  %p3837_p10 = scmp.lt.u32.totalorder %s3829_s27, %s4603_s30 }
 0x3c5   : > { %p3831_p0 = pnand %p3830_p9, %p4107_p5 }
 0x3c6   : > { %p3836_p6 = por %p3835_p13, %p3834_p8 }
 0x3c7   : > { %p3832_p11 = pneg %p3831_p0 }
 0x3c8   : > { %p3838_p3 = por %p3837_p10, %p3836_p6 }
 0x3ca   : > { %p3839_p7 = pnand %p3838_p3, %p3832_p11 }
 0x3cc   : > { %3842 = shalt.err (!%p3839_p7)
}
 0x3cd   : > { %s3902_s22 = smov 256   ;;  %s3903_s10 = smov 16  }
 0x3ce   : > { %3446 = dma.vmem_to_hbm [thread:$0]  (%p4107_p5), %s4605_s21, 2048, %s4603_s30, %s2759_s17, %s3902_s22, %s3902_s22, %s3903_s10  }
 0x3cf PF: > { %s4698_s12 = sld [smem:[#allocation16_spill]]  ;;  %s4699_s18 = sld [smem:[#allocation17_spill]] }
 0x3d0   : > { %p4701_p2 = scmp.ge.s32.totalorder %s3889_s16, 2 }
 0x3d5   : > { %s2787_s28 = sand.u32 1, %s4698_s12   ;;  %p4700_p12 = scmp.ne.s32.totalorder %s4699_s18, 0 }
 0x3d6   : > { %s2788_s27 = scalar_lea.sflag [#allocation5], %s2787_s28 }
 0x3d7   : > { %p3463_p1 = pnand %p4701_p2, %p4700_p12 }
 0x3d9   : > { %3872 = dma.done.wait (!%p3463_p1), %s2788_s27, 2048  }
 0x3da   : > { %3874 = vsyncadd (!%p3463_p1), %s2788_s27, 4294965248  ;;  %p25_p4 = scmp.ge.s32.totalorder %s4093_s9, 4   ;;  %s4702_s13 = smov %s3881_s14 }
 0x3db   : > { %s4703_s14 = smov %s3885_s15  ;;  %s4704_s15 = smov %s4103_s20 }
 0x3dc   : > { %s4705_s16 = smov %s4093_s9  ;;  %27 = sbr.rel (!%p25_p4) target bundleno = 10 (0xa), region = 122 }
 0x3e3   :  { %2793 = vsyncpa [#allocation4], 1 }
 0x3e4   :  { %2795 = vsyncpa [#allocation4 + $0x1], 1 }
 0x3e5   :  { %2796 = vsyncpa [#allocation7], 1 }
 0x3e6   :  { %2797 = vsyncpa [#allocation10], 1 }
 0x3e7   :  { %2798 = vsyncpa [#allocation5], 1 }
 0x3e8   :  { %2800 = vsyncpa [#allocation5 + $0x1], 1 }

</bundles_post_ra>
